<compile_context>
chip_gen: v6e
topology: v6e:2x2x1
jax: 0.10.0
libtpu: 0.0.40
codegen_flags: <defaults>
</compile_context>

<pallas_src>
import functools

import numpy as np
import jax
import jax.numpy as jnp
from jax import lax
from jax.experimental import pallas as pl
from jax.experimental.pallas import tpu as pltpu

BN_EPS = 1e-5


def _compiler_params():
    return pltpu.CompilerParams(dimension_semantics=("parallel",))


def _round_up(x, m):
    return (x + m - 1) // m * m


def _block_geom(H, W, stride):
    """Geometry of one BasicBlock on the padded-flat spatial layout."""
    Wp = W + 2                                    # padded input row width
    Ho = (H - 1) // stride + 1                    # 3x3, pad=1 output height
    Wo = (W - 1) // stride + 1
    Wop = Wo + 2                                  # padded output row width
    Top = (Ho + 2) * Wop                          # padded-flat output size
    Tq1 = stride * (Ho - 1) * Wp + stride * (Wo - 1) + 1    # conv1 window len
    Tq2 = (Ho - 1) * Wop + (Wo - 1) + 1                     # conv2 window len
    Tst = _round_up(Top, 128)                     # lane-dense store width
    return Wp, Ho, Wo, Wop, Top, Tq1, Tq2, Tst


def _scatter_matrix(Ho, Wo, Wq, Wop, stride, Tq, Tst):
    """0/1 matrix: conv-window position q -> padded-flat output position r.

    Rows for window positions that are not on the stride grid (or are the
    wrap-around garbage columns) are all-zero, so one matmul simultaneously
    applies the stride, drops garbage and rebuilds the zero padding ring.
    """
    S = np.zeros((Tq, Tst), np.float32)
    for yo in range(Ho):
        for xo in range(Wo):
            q = stride * yo * Wq + stride * xo
            r = (yo + 1) * Wop + (xo + 1)
            S[q, r] = 1.0
    return jnp.asarray(S, jnp.bfloat16)


# ------------------------------------------------------------------------------
# One fused BasicBlock: conv1(3x3, stride s)+BN+ReLU -> conv2(3x3)+BN
#                       (+ 1x1 downsample+BN) + residual + ReLU.
# Activations: (C, padded_flat_spatial) bf16, spatial on the lane axis.
# ------------------------------------------------------------------------------
def _basic_block_kernel(x_ref, w1_ref, s1_ref, b1_ref, w2_ref, s2_ref, b2_ref,
                        sc1_ref, sc2_ref, *rest, wp, wop, tq1, tq2, has_down):
    if has_down:
        wd_ref, sd_ref, bd_ref, o_ref = rest
    else:
        (o_ref,) = rest

    f32 = jnp.float32
    bf16 = jnp.bfloat16
    x = x_ref[0]                                              # (Cin, Tp) bf16

    # --- conv1 (3x3, stride folded into sc1) + BN + ReLU; out1 stays on-chip
    acc1 = None
    for ky in range(3):
        for kx in range(3):
            xt = x[:, ky * wp + kx: ky * wp + kx + tq1]       # (Cin, Tq1)
            d = jnp.dot(w1_ref[ky * 3 + kx], xt, preferred_element_type=f32)
            acc1 = d if acc1 is None else acc1 + d
    h1 = jnp.maximum(acc1 * s1_ref[...] + b1_ref[...], 0.0)   # (P, Tq1) f32
    # scatter window -> padded (Ho+2, Wo+2) grid (stride + zero ring), exact
    out1 = jnp.dot(h1.astype(bf16), sc1_ref[...], preferred_element_type=f32)
    out1 = out1.astype(bf16)                                  # (P, Tst)

    # --- conv2 (3x3, stride 1) + BN
    acc2 = None
    for ky in range(3):
        for kx in range(3):
            ot = out1[:, ky * wop + kx: ky * wop + kx + tq2]  # (P, Tq2)
            d = jnp.dot(w2_ref[ky * 3 + kx], ot, preferred_element_type=f32)
            acc2 = d if acc2 is None else acc2 + d
    h2 = acc2 * s2_ref[...] + b2_ref[...]                     # (P, Tq2) f32

    # --- identity path
    if has_down:
        xc = x[:, wp + 1: wp + 1 + tq1]                       # center-tap window
        idf = jnp.dot(wd_ref[...], xc, preferred_element_type=f32)
        idf = idf * sd_ref[...] + bd_ref[...]
        idp = jnp.dot(idf.astype(bf16), sc1_ref[...], preferred_element_type=f32)
        ident = idp[:, wop + 1: wop + 1 + tq2]                # (P, Tq2)
    else:
        ident = x[:, wp + 1: wp + 1 + tq2].astype(f32)

    # --- residual add + ReLU, scatter to padded-flat output (lane-dense store)
    o = jnp.maximum(h2 + ident, 0.0)
    op = jnp.dot(o.astype(bf16), sc2_ref[...], preferred_element_type=f32)
    o_ref[0] = op.astype(o_ref.dtype)


def basic_block_fused(x_flat, params, H, W):
    """x_flat: (N, Cin, Tp) bf16, padded-flat spatial (zero ring)."""
    N, Cin, Tp = x_flat.shape
    stride = params["stride"]
    P = params["w1"].shape[1]
    Wp, Ho, Wo, Wop, Top, Tq1, Tq2, Tst = _block_geom(H, W, stride)
    assert Tp >= (H + 2) * Wp

    sc1 = _scatter_matrix(Ho, Wo, Wp, Wop, stride, Tq1, Tst)   # conv1 / dnsample
    sc2 = _scatter_matrix(Ho, Wo, Wop, Wop, 1, Tq2, Tst)       # block output

    w1 = params["w1"].astype(jnp.bfloat16)                     # (9, P, Cin)
    w2 = params["w2"].astype(jnp.bfloat16)                     # (9, P, P)
    has_down = params["downsample"] is not None

    args = [x_flat, w1, params["s1"], params["b1"], w2, params["s2"],
            params["b2"], sc1, sc2]
    in_specs = [
        pl.BlockSpec((1, Cin, Tp), lambda n: (n, 0, 0)),
        pl.BlockSpec((9, P, Cin), lambda n: (0, 0, 0)),
        pl.BlockSpec((P, 1), lambda n: (0, 0)),
        pl.BlockSpec((P, 1), lambda n: (0, 0)),
        pl.BlockSpec((9, P, P), lambda n: (0, 0, 0)),
        pl.BlockSpec((P, 1), lambda n: (0, 0)),
        pl.BlockSpec((P, 1), lambda n: (0, 0)),
        pl.BlockSpec((Tq1, Tst), lambda n: (0, 0)),
        pl.BlockSpec((Tq2, Tst), lambda n: (0, 0)),
    ]
    if has_down:
        d = params["downsample"]
        args += [d["w"].reshape(P, Cin).astype(jnp.bfloat16), d["s"], d["b"]]
        in_specs += [
            pl.BlockSpec((P, Cin), lambda n: (0, 0)),
            pl.BlockSpec((P, 1), lambda n: (0, 0)),
            pl.BlockSpec((P, 1), lambda n: (0, 0)),
        ]

    kernel = functools.partial(_basic_block_kernel, wp=Wp, wop=Wop,
                               tq1=Tq1, tq2=Tq2, has_down=has_down)
    out = pl.pallas_call(
        kernel,
        out_shape=jax.ShapeDtypeStruct((N, P, Tst), jnp.bfloat16),
        grid=(N,),
        in_specs=in_specs,
        out_specs=pl.BlockSpec((1, P, Tst), lambda n: (n, 0, 0)),
        compiler_params=_compiler_params(),
    )(*args)
    return out, Ho, Wo


# ------------------------------------------------------------------------------
# Parameter init (matches the PyTorch module's init) and layer glue
# ------------------------------------------------------------------------------
def _kaiming_fan_out(key, taps, cout, cin):
    # nn.init.kaiming_normal_(mode='fan_out', nonlinearity='relu')
    std = np.sqrt(2.0 / (cout * taps))
    return jax.random.normal(key, (taps, cout, cin), jnp.float32) * std


def _bn_fold(c):
    # gamma=1, beta=0 (constant init), running_mean=0, running_var=1 (fresh BN)
    gamma = jnp.ones((c,), jnp.float32)
    beta = jnp.zeros((c,), jnp.float32)
    mean = jnp.zeros((c,), jnp.float32)
    var = jnp.ones((c,), jnp.float32)
    scale = gamma / jnp.sqrt(var + BN_EPS)
    bias = beta - mean * scale
    return scale.reshape(c, 1), bias.reshape(c, 1)


def init_basic_block(key, inplanes, planes, stride):
    k1, k2, k3 = jax.random.split(key, 3)
    p = {"stride": stride,
         "w1": _kaiming_fan_out(k1, 9, planes, inplanes),
         "w2": _kaiming_fan_out(k2, 9, planes, planes)}
    p["s1"], p["b1"] = _bn_fold(planes)
    p["s2"], p["b2"] = _bn_fold(planes)
    if stride != 1 or inplanes != planes:     # BasicBlock.expansion == 1
        d = {"w": _kaiming_fan_out(k3, 1, planes, inplanes)}
        d["s"], d["b"] = _bn_fold(planes)
        p["downsample"] = d
    else:
        p["downsample"] = None
    return p


def init_resnet_layer(key, num_block, inplanes, planes, stride):
    keys = jax.random.split(key, num_block)
    blocks = [init_basic_block(keys[0], inplanes, planes, stride)]
    for i in range(1, num_block):
        blocks.append(init_basic_block(keys[i], planes, planes, 1))
    return blocks


def resnet_layer_forward(x_nchw, blocks):
    # single pad at layer entry; blocks then chain HBM->HBM in padded-flat bf16
    N, Cin, H, W = x_nchw.shape
    xp = jnp.pad(x_nchw.astype(jnp.bfloat16), ((0, 0), (0, 0), (1, 1), (1, 1)))
    x_flat = xp.reshape(N, Cin, (H + 2) * (W + 2))
    h, w = H, W
    for p in blocks:
        x_flat, h, w = basic_block_fused(x_flat, p, h, w)
    P = x_flat.shape[1]
    wop = w + 2
    top = (h + 2) * wop
    out = x_flat[:, :, :top].reshape(N, P, h + 2, wop)[:, :, 1:1 + h, 1:1 + w]
    return out.astype(jnp.float32)            # already NCHW, no transpose


# ------------------------------------------------------------------------------
# Pure-JAX reference mirroring the bf16 matmul inputs / f32 accumulation
# ------------------------------------------------------------------------------
def _conv_ref(x_bf16, w9, ksize, stride, pad):
    cout, cin = w9.shape[1], w9.shape[2]
    wk = jnp.transpose(w9.reshape(ksize, ksize, cout, cin),
                       (2, 3, 0, 1)).astype(jnp.bfloat16)      # OIHW
    return lax.conv_general_dilated(
        x_bf16, wk, (stride, stride), [(pad, pad), (pad, pad)],
        dimension_numbers=("NCHW", "OIHW", "NCHW"),
        preferred_element_type=jnp.float32)


def _bn_ref(y, s, b):
    return y * s.reshape(1, -1, 1, 1) + b.reshape(1, -1, 1, 1)


def _block_ref(x, p):
    stride = p["stride"]
    out1 = jnp.maximum(_bn_ref(_conv_ref(x, p["w1"], 3, stride, 1),
                               p["s1"], p["b1"]), 0.0).astype(jnp.bfloat16)
    out2 = _bn_ref(_conv_ref(out1, p["w2"], 3, 1, 1), p["s2"], p["b2"])
    if p["downsample"] is not None:
        d = p["downsample"]
        idn = _bn_ref(_conv_ref(x, d["w"], 1, stride, 0),
                      d["s"], d["b"]).astype(jnp.bfloat16)
    else:
        idn = x
    return jnp.maximum(out2 + idn.astype(jnp.float32), 0.0).astype(jnp.bfloat16)


def resnet_layer_ref(x_nchw, blocks):
    x = x_nchw.astype(jnp.bfloat16)
    for p in blocks:
        x = _block_ref(x, p)
    return x.astype(jnp.float32)


# ------------------------------------------------------------------------------
if __name__ == "__main__":
    key = jax.random.PRNGKey(0)
    kx_, kp_ = jax.random.split(key)

    # ResNetLayer(block=BasicBlock, num_block=2, inplanes=4, planes=8, stride=2)
    N, inplanes, H, W = 2, 4, 16, 16
    planes, stride, num_block = 8, 2, 2

    x_nchw = jax.random.normal(kx_, (N, inplanes, H, W), jnp.float32)
    layer_params = init_resnet_layer(kp_, num_block, inplanes, planes, stride)

    fwd = jax.jit(lambda x: resnet_layer_forward(x, layer_params))
    out_nchw = jax.block_until_ready(fwd(x_nchw))

    # sanity check against a pure-JAX reference of the same (bf16-input) math
    ref = resnet_layer_ref(x_nchw, layer_params)
    np.testing.assert_allclose(np.asarray(out_nchw), np.asarray(ref),
                               rtol=2e-2, atol=2e-2)

    print("KERNEL_OK")
</pallas_src>

<mosaic_0001>
module attributes {stable_mosaic.version = 11 : i64} {
  func.func @_basic_block_kernel(%arg0: i32, %arg1: memref<1x4x324xbf16, #tpu.memory_space<vmem>>, %arg2: memref<9x8x4xbf16, #tpu.memory_space<vmem>>, %arg3: memref<8x1xf32, #tpu.memory_space<vmem>>, %arg4: memref<8x1xf32, #tpu.memory_space<vmem>>, %arg5: memref<9x8x8xbf16, #tpu.memory_space<vmem>>, %arg6: memref<8x1xf32, #tpu.memory_space<vmem>>, %arg7: memref<8x1xf32, #tpu.memory_space<vmem>>, %arg8: memref<267x128xbf16, #tpu.memory_space<vmem>>, %arg9: memref<78x128xbf16, #tpu.memory_space<vmem>>, %arg10: memref<8x4xbf16, #tpu.memory_space<vmem>>, %arg11: memref<8x1xf32, #tpu.memory_space<vmem>>, %arg12: memref<8x1xf32, #tpu.memory_space<vmem>>, %arg13: memref<1x8x128xbf16, #tpu.memory_space<vmem>>) attributes {dimension_semantics = [#tpu.dimension_semantics<parallel>], iteration_bounds = array<i64: 2>, scalar_prefetch = 0 : i64, scratch_operands = 0 : i64, tpu.core_type = #tpu.core_type<tc>, window_params = [{transform_indices = @transform_0, window_bounds = array<i64: 1, 4, 324>}, {pipeline_mode = #tpu.pipeline_mode<synchronous>, transform_indices = @transform_1, window_bounds = array<i64: 9, 8, 4>}, {pipeline_mode = #tpu.pipeline_mode<synchronous>, transform_indices = @transform_2, window_bounds = array<i64: 8, 1>}, {pipeline_mode = #tpu.pipeline_mode<synchronous>, transform_indices = @transform_3, window_bounds = array<i64: 8, 1>}, {pipeline_mode = #tpu.pipeline_mode<synchronous>, transform_indices = @transform_4, window_bounds = array<i64: 9, 8, 8>}, {pipeline_mode = #tpu.pipeline_mode<synchronous>, transform_indices = @transform_5, window_bounds = array<i64: 8, 1>}, {pipeline_mode = #tpu.pipeline_mode<synchronous>, transform_indices = @transform_6, window_bounds = array<i64: 8, 1>}, {pipeline_mode = #tpu.pipeline_mode<synchronous>, transform_indices = @transform_7, window_bounds = array<i64: 267, 128>}, {pipeline_mode = #tpu.pipeline_mode<synchronous>, transform_indices = @transform_8, window_bounds = array<i64: 78, 128>}, {pipeline_mode = #tpu.pipeline_mode<synchronous>, transform_indices = @transform_9, window_bounds = array<i64: 8, 4>}, {pipeline_mode = #tpu.pipeline_mode<synchronous>, transform_indices = @transform_10, window_bounds = array<i64: 8, 1>}, {pipeline_mode = #tpu.pipeline_mode<synchronous>, transform_indices = @transform_11, window_bounds = array<i64: 8, 1>}, {transform_indices = @transform_12, window_bounds = array<i64: 1, 8, 128>}]} {
    %c0 = arith.constant 0 : index
    %c0_0 = arith.constant 0 : index
    %c0_1 = arith.constant 0 : index
    %0 = vector.load %arg1[%c0, %c0_0, %c0_1] : memref<1x4x324xbf16, #tpu.memory_space<vmem>>, vector<1x4x324xbf16>
    %1 = vector.shape_cast %0 : vector<1x4x324xbf16> to vector<4x324xbf16>
    %2 = vector.extract_strided_slice %1 {offsets = [0, 0], sizes = [4, 267], strides = [1, 1]} : vector<4x324xbf16> to vector<4x267xbf16>
    %c0_2 = arith.constant 0 : index
    %c0_3 = arith.constant 0 : index
    %c0_4 = arith.constant 0 : index
    %3 = vector.load %arg2[%c0_2, %c0_3, %c0_4] : memref<9x8x4xbf16, #tpu.memory_space<vmem>>, vector<1x8x4xbf16>
    %4 = vector.shape_cast %3 : vector<1x8x4xbf16> to vector<8x4xbf16>
    %cst = arith.constant dense<0.000000e+00> : vector<8x267xf32>
    %5 = tpu.matmul %4, %2, %cst {dimension_numbers = #tpu.dot_dimension_numbers<[1], [0], [0], [1], [0, 0, 1, 1], [], []>} : vector<8x4xbf16>, vector<4x267xbf16>, vector<8x267xf32> -> vector<8x267xf32>
    %6 = vector.extract_strided_slice %1 {offsets = [0, 1], sizes = [4, 267], strides = [1, 1]} : vector<4x324xbf16> to vector<4x267xbf16>
    %c1 = arith.constant 1 : index
    %c0_5 = arith.constant 0 : index
    %c0_6 = arith.constant 0 : index
    %7 = vector.load %arg2[%c1, %c0_5, %c0_6] : memref<9x8x4xbf16, #tpu.memory_space<vmem>>, vector<1x8x4xbf16>
    %8 = vector.shape_cast %7 : vector<1x8x4xbf16> to vector<8x4xbf16>
    %cst_7 = arith.constant dense<0.000000e+00> : vector<8x267xf32>
    %9 = tpu.matmul %8, %6, %cst_7 {dimension_numbers = #tpu.dot_dimension_numbers<[1], [0], [0], [1], [0, 0, 1, 1], [], []>} : vector<8x4xbf16>, vector<4x267xbf16>, vector<8x267xf32> -> vector<8x267xf32>
    %10 = arith.addf %5, %9 : vector<8x267xf32>
    %11 = vector.extract_strided_slice %1 {offsets = [0, 2], sizes = [4, 267], strides = [1, 1]} : vector<4x324xbf16> to vector<4x267xbf16>
    %c2 = arith.constant 2 : index
    %c0_8 = arith.constant 0 : index
    %c0_9 = arith.constant 0 : index
    %12 = vector.load %arg2[%c2, %c0_8, %c0_9] : memref<9x8x4xbf16, #tpu.memory_space<vmem>>, vector<1x8x4xbf16>
    %13 = vector.shape_cast %12 : vector<1x8x4xbf16> to vector<8x4xbf16>
    %cst_10 = arith.constant dense<0.000000e+00> : vector<8x267xf32>
    %14 = tpu.matmul %13, %11, %cst_10 {dimension_numbers = #tpu.dot_dimension_numbers<[1], [0], [0], [1], [0, 0, 1, 1], [], []>} : vector<8x4xbf16>, vector<4x267xbf16>, vector<8x267xf32> -> vector<8x267xf32>
    %15 = arith.addf %10, %14 : vector<8x267xf32>
    %16 = vector.extract_strided_slice %1 {offsets = [0, 18], sizes = [4, 267], strides = [1, 1]} : vector<4x324xbf16> to vector<4x267xbf16>
    %c3 = arith.constant 3 : index
    %c0_11 = arith.constant 0 : index
    %c0_12 = arith.constant 0 : index
    %17 = vector.load %arg2[%c3, %c0_11, %c0_12] : memref<9x8x4xbf16, #tpu.memory_space<vmem>>, vector<1x8x4xbf16>
    %18 = vector.shape_cast %17 : vector<1x8x4xbf16> to vector<8x4xbf16>
    %cst_13 = arith.constant dense<0.000000e+00> : vector<8x267xf32>
    %19 = tpu.matmul %18, %16, %cst_13 {dimension_numbers = #tpu.dot_dimension_numbers<[1], [0], [0], [1], [0, 0, 1, 1], [], []>} : vector<8x4xbf16>, vector<4x267xbf16>, vector<8x267xf32> -> vector<8x267xf32>
    %20 = arith.addf %15, %19 : vector<8x267xf32>
    %21 = vector.extract_strided_slice %1 {offsets = [0, 19], sizes = [4, 267], strides = [1, 1]} : vector<4x324xbf16> to vector<4x267xbf16>
    %c4 = arith.constant 4 : index
    %c0_14 = arith.constant 0 : index
    %c0_15 = arith.constant 0 : index
    %22 = vector.load %arg2[%c4, %c0_14, %c0_15] : memref<9x8x4xbf16, #tpu.memory_space<vmem>>, vector<1x8x4xbf16>
    %23 = vector.shape_cast %22 : vector<1x8x4xbf16> to vector<8x4xbf16>
    %cst_16 = arith.constant dense<0.000000e+00> : vector<8x267xf32>
    %24 = tpu.matmul %23, %21, %cst_16 {dimension_numbers = #tpu.dot_dimension_numbers<[1], [0], [0], [1], [0, 0, 1, 1], [], []>} : vector<8x4xbf16>, vector<4x267xbf16>, vector<8x267xf32> -> vector<8x267xf32>
    %25 = arith.addf %20, %24 : vector<8x267xf32>
    %26 = vector.extract_strided_slice %1 {offsets = [0, 20], sizes = [4, 267], strides = [1, 1]} : vector<4x324xbf16> to vector<4x267xbf16>
    %c5 = arith.constant 5 : index
    %c0_17 = arith.constant 0 : index
    %c0_18 = arith.constant 0 : index
    %27 = vector.load %arg2[%c5, %c0_17, %c0_18] : memref<9x8x4xbf16, #tpu.memory_space<vmem>>, vector<1x8x4xbf16>
    %28 = vector.shape_cast %27 : vector<1x8x4xbf16> to vector<8x4xbf16>
    %cst_19 = arith.constant dense<0.000000e+00> : vector<8x267xf32>
    %29 = tpu.matmul %28, %26, %cst_19 {dimension_numbers = #tpu.dot_dimension_numbers<[1], [0], [0], [1], [0, 0, 1, 1], [], []>} : vector<8x4xbf16>, vector<4x267xbf16>, vector<8x267xf32> -> vector<8x267xf32>
    %30 = arith.addf %25, %29 : vector<8x267xf32>
    %31 = vector.extract_strided_slice %1 {offsets = [0, 36], sizes = [4, 267], strides = [1, 1]} : vector<4x324xbf16> to vector<4x267xbf16>
    %c6 = arith.constant 6 : index
    %c0_20 = arith.constant 0 : index
    %c0_21 = arith.constant 0 : index
    %32 = vector.load %arg2[%c6, %c0_20, %c0_21] : memref<9x8x4xbf16, #tpu.memory_space<vmem>>, vector<1x8x4xbf16>
    %33 = vector.shape_cast %32 : vector<1x8x4xbf16> to vector<8x4xbf16>
    %cst_22 = arith.constant dense<0.000000e+00> : vector<8x267xf32>
    %34 = tpu.matmul %33, %31, %cst_22 {dimension_numbers = #tpu.dot_dimension_numbers<[1], [0], [0], [1], [0, 0, 1, 1], [], []>} : vector<8x4xbf16>, vector<4x267xbf16>, vector<8x267xf32> -> vector<8x267xf32>
    %35 = arith.addf %30, %34 : vector<8x267xf32>
    %36 = vector.extract_strided_slice %1 {offsets = [0, 37], sizes = [4, 267], strides = [1, 1]} : vector<4x324xbf16> to vector<4x267xbf16>
    %c7 = arith.constant 7 : index
    %c0_23 = arith.constant 0 : index
    %c0_24 = arith.constant 0 : index
    %37 = vector.load %arg2[%c7, %c0_23, %c0_24] : memref<9x8x4xbf16, #tpu.memory_space<vmem>>, vector<1x8x4xbf16>
    %38 = vector.shape_cast %37 : vector<1x8x4xbf16> to vector<8x4xbf16>
    %cst_25 = arith.constant dense<0.000000e+00> : vector<8x267xf32>
    %39 = tpu.matmul %38, %36, %cst_25 {dimension_numbers = #tpu.dot_dimension_numbers<[1], [0], [0], [1], [0, 0, 1, 1], [], []>} : vector<8x4xbf16>, vector<4x267xbf16>, vector<8x267xf32> -> vector<8x267xf32>
    %40 = arith.addf %35, %39 : vector<8x267xf32>
    %41 = vector.extract_strided_slice %1 {offsets = [0, 38], sizes = [4, 267], strides = [1, 1]} : vector<4x324xbf16> to vector<4x267xbf16>
    %c8 = arith.constant 8 : index
    %c0_26 = arith.constant 0 : index
    %c0_27 = arith.constant 0 : index
    %42 = vector.load %arg2[%c8, %c0_26, %c0_27] : memref<9x8x4xbf16, #tpu.memory_space<vmem>>, vector<1x8x4xbf16>
    %43 = vector.shape_cast %42 : vector<1x8x4xbf16> to vector<8x4xbf16>
    %cst_28 = arith.constant dense<0.000000e+00> : vector<8x267xf32>
    %44 = tpu.matmul %43, %41, %cst_28 {dimension_numbers = #tpu.dot_dimension_numbers<[1], [0], [0], [1], [0, 0, 1, 1], [], []>} : vector<8x4xbf16>, vector<4x267xbf16>, vector<8x267xf32> -> vector<8x267xf32>
    %45 = arith.addf %40, %44 : vector<8x267xf32>
    %c0_29 = arith.constant 0 : index
    %c0_30 = arith.constant 0 : index
    %46 = vector.load %arg3[%c0_29, %c0_30] : memref<8x1xf32, #tpu.memory_space<vmem>>, vector<8x1xf32>
    %47 = vector.broadcast %46 : vector<8x1xf32> to vector<8x267xf32>
    %48 = arith.mulf %45, %47 : vector<8x267xf32>
    %c0_31 = arith.constant 0 : index
    %c0_32 = arith.constant 0 : index
    %49 = vector.load %arg4[%c0_31, %c0_32] : memref<8x1xf32, #tpu.memory_space<vmem>>, vector<8x1xf32>
    %50 = vector.broadcast %49 : vector<8x1xf32> to vector<8x267xf32>
    %51 = arith.addf %48, %50 : vector<8x267xf32>
    %cst_33 = arith.constant 0.000000e+00 : f32
    %52 = vector.broadcast %cst_33 : f32 to vector<8x267xf32>
    %53 = arith.maximumf %51, %52 : vector<8x267xf32>
    %54 = arith.truncf %53 : vector<8x267xf32> to vector<8x267xbf16>
    %c0_34 = arith.constant 0 : index
    %c0_35 = arith.constant 0 : index
    %55 = vector.load %arg8[%c0_34, %c0_35] : memref<267x128xbf16, #tpu.memory_space<vmem>>, vector<267x128xbf16>
    %cst_36 = arith.constant dense<0.000000e+00> : vector<8x128xf32>
    %56 = tpu.matmul %54, %55, %cst_36 {dimension_numbers = #tpu.dot_dimension_numbers<[1], [0], [0], [1], [0, 0, 1, 1], [], []>} : vector<8x267xbf16>, vector<267x128xbf16>, vector<8x128xf32> -> vector<8x128xf32>
    %57 = arith.truncf %56 : vector<8x128xf32> to vector<8x128xbf16>
    %58 = vector.extract_strided_slice %57 {offsets = [0, 0], sizes = [8, 78], strides = [1, 1]} : vector<8x128xbf16> to vector<8x78xbf16>
    %c0_37 = arith.constant 0 : index
    %c0_38 = arith.constant 0 : index
    %c0_39 = arith.constant 0 : index
    %59 = vector.load %arg5[%c0_37, %c0_38, %c0_39] : memref<9x8x8xbf16, #tpu.memory_space<vmem>>, vector<1x8x8xbf16>
    %60 = vector.shape_cast %59 : vector<1x8x8xbf16> to vector<8x8xbf16>
    %cst_40 = arith.constant dense<0.000000e+00> : vector<8x78xf32>
    %61 = tpu.matmul %60, %58, %cst_40 {dimension_numbers = #tpu.dot_dimension_numbers<[1], [0], [0], [1], [0, 0, 1, 1], [], []>} : vector<8x8xbf16>, vector<8x78xbf16>, vector<8x78xf32> -> vector<8x78xf32>
    %62 = vector.extract_strided_slice %57 {offsets = [0, 1], sizes = [8, 78], strides = [1, 1]} : vector<8x128xbf16> to vector<8x78xbf16>
    %c1_41 = arith.constant 1 : index
    %c0_42 = arith.constant 0 : index
    %c0_43 = arith.constant 0 : index
    %63 = vector.load %arg5[%c1_41, %c0_42, %c0_43] : memref<9x8x8xbf16, #tpu.memory_space<vmem>>, vector<1x8x8xbf16>
    %64 = vector.shape_cast %63 : vector<1x8x8xbf16> to vector<8x8xbf16>
    %cst_44 = arith.constant dense<0.000000e+00> : vector<8x78xf32>
    %65 = tpu.matmul %64, %62, %cst_44 {dimension_numbers = #tpu.dot_dimension_numbers<[1], [0], [0], [1], [0, 0, 1, 1], [], []>} : vector<8x8xbf16>, vector<8x78xbf16>, vector<8x78xf32> -> vector<8x78xf32>
    %66 = arith.addf %61, %65 : vector<8x78xf32>
    %67 = vector.extract_strided_slice %57 {offsets = [0, 2], sizes = [8, 78], strides = [1, 1]} : vector<8x128xbf16> to vector<8x78xbf16>
    %c2_45 = arith.constant 2 : index
    %c0_46 = arith.constant 0 : index
    %c0_47 = arith.constant 0 : index
    %68 = vector.load %arg5[%c2_45, %c0_46, %c0_47] : memref<9x8x8xbf16, #tpu.memory_space<vmem>>, vector<1x8x8xbf16>
    %69 = vector.shape_cast %68 : vector<1x8x8xbf16> to vector<8x8xbf16>
    %cst_48 = arith.constant dense<0.000000e+00> : vector<8x78xf32>
    %70 = tpu.matmul %69, %67, %cst_48 {dimension_numbers = #tpu.dot_dimension_numbers<[1], [0], [0], [1], [0, 0, 1, 1], [], []>} : vector<8x8xbf16>, vector<8x78xbf16>, vector<8x78xf32> -> vector<8x78xf32>
    %71 = arith.addf %66, %70 : vector<8x78xf32>
    %72 = vector.extract_strided_slice %57 {offsets = [0, 10], sizes = [8, 78], strides = [1, 1]} : vector<8x128xbf16> to vector<8x78xbf16>
    %c3_49 = arith.constant 3 : index
    %c0_50 = arith.constant 0 : index
    %c0_51 = arith.constant 0 : index
    %73 = vector.load %arg5[%c3_49, %c0_50, %c0_51] : memref<9x8x8xbf16, #tpu.memory_space<vmem>>, vector<1x8x8xbf16>
    %74 = vector.shape_cast %73 : vector<1x8x8xbf16> to vector<8x8xbf16>
    %cst_52 = arith.constant dense<0.000000e+00> : vector<8x78xf32>
    %75 = tpu.matmul %74, %72, %cst_52 {dimension_numbers = #tpu.dot_dimension_numbers<[1], [0], [0], [1], [0, 0, 1, 1], [], []>} : vector<8x8xbf16>, vector<8x78xbf16>, vector<8x78xf32> -> vector<8x78xf32>
    %76 = arith.addf %71, %75 : vector<8x78xf32>
    %77 = vector.extract_strided_slice %57 {offsets = [0, 11], sizes = [8, 78], strides = [1, 1]} : vector<8x128xbf16> to vector<8x78xbf16>
    %c4_53 = arith.constant 4 : index
    %c0_54 = arith.constant 0 : index
    %c0_55 = arith.constant 0 : index
    %78 = vector.load %arg5[%c4_53, %c0_54, %c0_55] : memref<9x8x8xbf16, #tpu.memory_space<vmem>>, vector<1x8x8xbf16>
    %79 = vector.shape_cast %78 : vector<1x8x8xbf16> to vector<8x8xbf16>
    %cst_56 = arith.constant dense<0.000000e+00> : vector<8x78xf32>
    %80 = tpu.matmul %79, %77, %cst_56 {dimension_numbers = #tpu.dot_dimension_numbers<[1], [0], [0], [1], [0, 0, 1, 1], [], []>} : vector<8x8xbf16>, vector<8x78xbf16>, vector<8x78xf32> -> vector<8x78xf32>
    %81 = arith.addf %76, %80 : vector<8x78xf32>
    %82 = vector.extract_strided_slice %57 {offsets = [0, 12], sizes = [8, 78], strides = [1, 1]} : vector<8x128xbf16> to vector<8x78xbf16>
    %c5_57 = arith.constant 5 : index
    %c0_58 = arith.constant 0 : index
    %c0_59 = arith.constant 0 : index
    %83 = vector.load %arg5[%c5_57, %c0_58, %c0_59] : memref<9x8x8xbf16, #tpu.memory_space<vmem>>, vector<1x8x8xbf16>
    %84 = vector.shape_cast %83 : vector<1x8x8xbf16> to vector<8x8xbf16>
    %cst_60 = arith.constant dense<0.000000e+00> : vector<8x78xf32>
    %85 = tpu.matmul %84, %82, %cst_60 {dimension_numbers = #tpu.dot_dimension_numbers<[1], [0], [0], [1], [0, 0, 1, 1], [], []>} : vector<8x8xbf16>, vector<8x78xbf16>, vector<8x78xf32> -> vector<8x78xf32>
    %86 = arith.addf %81, %85 : vector<8x78xf32>
    %87 = vector.extract_strided_slice %57 {offsets = [0, 20], sizes = [8, 78], strides = [1, 1]} : vector<8x128xbf16> to vector<8x78xbf16>
    %c6_61 = arith.constant 6 : index
    %c0_62 = arith.constant 0 : index
    %c0_63 = arith.constant 0 : index
    %88 = vector.load %arg5[%c6_61, %c0_62, %c0_63] : memref<9x8x8xbf16, #tpu.memory_space<vmem>>, vector<1x8x8xbf16>
    %89 = vector.shape_cast %88 : vector<1x8x8xbf16> to vector<8x8xbf16>
    %cst_64 = arith.constant dense<0.000000e+00> : vector<8x78xf32>
    %90 = tpu.matmul %89, %87, %cst_64 {dimension_numbers = #tpu.dot_dimension_numbers<[1], [0], [0], [1], [0, 0, 1, 1], [], []>} : vector<8x8xbf16>, vector<8x78xbf16>, vector<8x78xf32> -> vector<8x78xf32>
    %91 = arith.addf %86, %90 : vector<8x78xf32>
    %92 = vector.extract_strided_slice %57 {offsets = [0, 21], sizes = [8, 78], strides = [1, 1]} : vector<8x128xbf16> to vector<8x78xbf16>
    %c7_65 = arith.constant 7 : index
    %c0_66 = arith.constant 0 : index
    %c0_67 = arith.constant 0 : index
    %93 = vector.load %arg5[%c7_65, %c0_66, %c0_67] : memref<9x8x8xbf16, #tpu.memory_space<vmem>>, vector<1x8x8xbf16>
    %94 = vector.shape_cast %93 : vector<1x8x8xbf16> to vector<8x8xbf16>
    %cst_68 = arith.constant dense<0.000000e+00> : vector<8x78xf32>
    %95 = tpu.matmul %94, %92, %cst_68 {dimension_numbers = #tpu.dot_dimension_numbers<[1], [0], [0], [1], [0, 0, 1, 1], [], []>} : vector<8x8xbf16>, vector<8x78xbf16>, vector<8x78xf32> -> vector<8x78xf32>
    %96 = arith.addf %91, %95 : vector<8x78xf32>
    %97 = vector.extract_strided_slice %57 {offsets = [0, 22], sizes = [8, 78], strides = [1, 1]} : vector<8x128xbf16> to vector<8x78xbf16>
    %c8_69 = arith.constant 8 : index
    %c0_70 = arith.constant 0 : index
    %c0_71 = arith.constant 0 : index
    %98 = vector.load %arg5[%c8_69, %c0_70, %c0_71] : memref<9x8x8xbf16, #tpu.memory_space<vmem>>, vector<1x8x8xbf16>
    %99 = vector.shape_cast %98 : vector<1x8x8xbf16> to vector<8x8xbf16>
    %cst_72 = arith.constant dense<0.000000e+00> : vector<8x78xf32>
    %100 = tpu.matmul %99, %97, %cst_72 {dimension_numbers = #tpu.dot_dimension_numbers<[1], [0], [0], [1], [0, 0, 1, 1], [], []>} : vector<8x8xbf16>, vector<8x78xbf16>, vector<8x78xf32> -> vector<8x78xf32>
    %101 = arith.addf %96, %100 : vector<8x78xf32>
    %c0_73 = arith.constant 0 : index
    %c0_74 = arith.constant 0 : index
    %102 = vector.load %arg6[%c0_73, %c0_74] : memref<8x1xf32, #tpu.memory_space<vmem>>, vector<8x1xf32>
    %103 = vector.broadcast %102 : vector<8x1xf32> to vector<8x78xf32>
    %104 = arith.mulf %101, %103 : vector<8x78xf32>
    %c0_75 = arith.constant 0 : index
    %c0_76 = arith.constant 0 : index
    %105 = vector.load %arg7[%c0_75, %c0_76] : memref<8x1xf32, #tpu.memory_space<vmem>>, vector<8x1xf32>
    %106 = vector.broadcast %105 : vector<8x1xf32> to vector<8x78xf32>
    %107 = arith.addf %104, %106 : vector<8x78xf32>
    %108 = vector.extract_strided_slice %1 {offsets = [0, 19], sizes = [4, 267], strides = [1, 1]} : vector<4x324xbf16> to vector<4x267xbf16>
    %c0_77 = arith.constant 0 : index
    %c0_78 = arith.constant 0 : index
    %109 = vector.load %arg10[%c0_77, %c0_78] : memref<8x4xbf16, #tpu.memory_space<vmem>>, vector<8x4xbf16>
    %cst_79 = arith.constant dense<0.000000e+00> : vector<8x267xf32>
    %110 = tpu.matmul %109, %108, %cst_79 {dimension_numbers = #tpu.dot_dimension_numbers<[1], [0], [0], [1], [0, 0, 1, 1], [], []>} : vector<8x4xbf16>, vector<4x267xbf16>, vector<8x267xf32> -> vector<8x267xf32>
    %c0_80 = arith.constant 0 : index
    %c0_81 = arith.constant 0 : index
    %111 = vector.load %arg11[%c0_80, %c0_81] : memref<8x1xf32, #tpu.memory_space<vmem>>, vector<8x1xf32>
    %112 = vector.broadcast %111 : vector<8x1xf32> to vector<8x267xf32>
    %113 = arith.mulf %110, %112 : vector<8x267xf32>
    %c0_82 = arith.constant 0 : index
    %c0_83 = arith.constant 0 : index
    %114 = vector.load %arg12[%c0_82, %c0_83] : memref<8x1xf32, #tpu.memory_space<vmem>>, vector<8x1xf32>
    %115 = vector.broadcast %114 : vector<8x1xf32> to vector<8x267xf32>
    %116 = arith.addf %113, %115 : vector<8x267xf32>
    %117 = arith.truncf %116 : vector<8x267xf32> to vector<8x267xbf16>
    %c0_84 = arith.constant 0 : index
    %c0_85 = arith.constant 0 : index
    %118 = vector.load %arg8[%c0_84, %c0_85] : memref<267x128xbf16, #tpu.memory_space<vmem>>, vector<267x128xbf16>
    %cst_86 = arith.constant dense<0.000000e+00> : vector<8x128xf32>
    %119 = tpu.matmul %117, %118, %cst_86 {dimension_numbers = #tpu.dot_dimension_numbers<[1], [0], [0], [1], [0, 0, 1, 1], [], []>} : vector<8x267xbf16>, vector<267x128xbf16>, vector<8x128xf32> -> vector<8x128xf32>
    %120 = vector.extract_strided_slice %119 {offsets = [0, 11], sizes = [8, 78], strides = [1, 1]} : vector<8x128xf32> to vector<8x78xf32>
    %121 = arith.addf %107, %120 : vector<8x78xf32>
    %cst_87 = arith.constant 0.000000e+00 : f32
    %122 = vector.broadcast %cst_87 : f32 to vector<8x78xf32>
    %123 = arith.maximumf %121, %122 : vector<8x78xf32>
    %124 = arith.truncf %123 : vector<8x78xf32> to vector<8x78xbf16>
    %c0_88 = arith.constant 0 : index
    %c0_89 = arith.constant 0 : index
    %125 = vector.load %arg9[%c0_88, %c0_89] : memref<78x128xbf16, #tpu.memory_space<vmem>>, vector<78x128xbf16>
    %cst_90 = arith.constant dense<0.000000e+00> : vector<8x128xf32>
    %126 = tpu.matmul %124, %125, %cst_90 {dimension_numbers = #tpu.dot_dimension_numbers<[1], [0], [0], [1], [0, 0, 1, 1], [], []>} : vector<8x78xbf16>, vector<78x128xbf16>, vector<8x128xf32> -> vector<8x128xf32>
    %127 = arith.truncf %126 : vector<8x128xf32> to vector<8x128xbf16>
    %c0_91 = arith.constant 0 : index
    %c0_92 = arith.constant 0 : index
    %c0_93 = arith.constant 0 : index
    %128 = vector.load %arg13[%c0_91, %c0_92, %c0_93] : memref<1x8x128xbf16, #tpu.memory_space<vmem>>, vector<1x8x128xbf16>
    %129 = vector.shape_cast %128 : vector<1x8x128xbf16> to vector<8x128xbf16>
    %130 = vector.shape_cast %127 : vector<8x128xbf16> to vector<1x8x128xbf16>
    tpu.vector_store %arg13[%c0_91, %c0_92, %c0_93], %130 {strides = array<i32>} : memref<1x8x128xbf16, #tpu.memory_space<vmem>>, vector<1x8x128xbf16>,
    return
  }
  func.func @transform_0(%arg0: i32) -> (i32, i32, i32) {
    %c0_i32 = arith.constant 0 : i32
    %c0_i32_0 = arith.constant 0 : i32
    %c0_i32_1 = arith.constant 0 : i32
    return %arg0, %c0_i32, %c0_i32_0 : i32, i32, i32
  }
  func.func @transform_1(%arg0: i32) -> (i32, i32, i32) {
    %c0_i32 = arith.constant 0 : i32
    %c0_i32_0 = arith.constant 0 : i32
    %c0_i32_1 = arith.constant 0 : i32
    %c0_i32_2 = arith.constant 0 : i32
    return %c0_i32, %c0_i32_0, %c0_i32_1 : i32, i32, i32
  }
  func.func @transform_2(%arg0: i32) -> (i32, i32) {
    %c0_i32 = arith.constant 0 : i32
    %c0_i32_0 = arith.constant 0 : i32
    %c0_i32_1 = arith.constant 0 : i32
    return %c0_i32, %c0_i32_0 : i32, i32
  }
  func.func @transform_3(%arg0: i32) -> (i32, i32) {
    %c0_i32 = arith.constant 0 : i32
    %c0_i32_0 = arith.constant 0 : i32
    %c0_i32_1 = arith.constant 0 : i32
    return %c0_i32, %c0_i32_0 : i32, i32
  }
  func.func @transform_4(%arg0: i32) -> (i32, i32, i32) {
    %c0_i32 = arith.constant 0 : i32
    %c0_i32_0 = arith.constant 0 : i32
    %c0_i32_1 = arith.constant 0 : i32
    %c0_i32_2 = arith.constant 0 : i32
    return %c0_i32, %c0_i32_0, %c0_i32_1 : i32, i32, i32
  }
  func.func @transform_5(%arg0: i32) -> (i32, i32) {
    %c0_i32 = arith.constant 0 : i32
    %c0_i32_0 = arith.constant 0 : i32
    %c0_i32_1 = arith.constant 0 : i32
    return %c0_i32, %c0_i32_0 : i32, i32
  }
  func.func @transform_6(%arg0: i32) -> (i32, i32) {
    %c0_i32 = arith.constant 0 : i32
    %c0_i32_0 = arith.constant 0 : i32
    %c0_i32_1 = arith.constant 0 : i32
    return %c0_i32, %c0_i32_0 : i32, i32
  }
  func.func @transform_7(%arg0: i32) -> (i32, i32) {
    %c0_i32 = arith.constant 0 : i32
    %c0_i32_0 = arith.constant 0 : i32
    %c0_i32_1 = arith.constant 0 : i32
    return %c0_i32, %c0_i32_0 : i32, i32
  }
  func.func @transform_8(%arg0: i32) -> (i32, i32) {
    %c0_i32 = arith.constant 0 : i32
    %c0_i32_0 = arith.constant 0 : i32
    %c0_i32_1 = arith.constant 0 : i32
    return %c0_i32, %c0_i32_0 : i32, i32
  }
  func.func @transform_9(%arg0: i32) -> (i32, i32) {
    %c0_i32 = arith.constant 0 : i32
    %c0_i32_0 = arith.constant 0 : i32
    %c0_i32_1 = arith.constant 0 : i32
    return %c0_i32, %c0_i32_0 : i32, i32
  }
  func.func @transform_10(%arg0: i32) -> (i32, i32) {
    %c0_i32 = arith.constant 0 : i32
    %c0_i32_0 = arith.constant 0 : i32
    %c0_i32_1 = arith.constant 0 : i32
    return %c0_i32, %c0_i32_0 : i32, i32
  }
  func.func @transform_11(%arg0: i32) -> (i32, i32) {
    %c0_i32 = arith.constant 0 : i32
    %c0_i32_0 = arith.constant 0 : i32
    %c0_i32_1 = arith.constant 0 : i32
    return %c0_i32, %c0_i32_0 : i32, i32
  }
  func.func @transform_12(%arg0: i32) -> (i32, i32, i32) {
    %c0_i32 = arith.constant 0 : i32
    %c0_i32_0 = arith.constant 0 : i32
    %c0_i32_1 = arith.constant 0 : i32
    return %arg0, %c0_i32, %c0_i32_0 : i32, i32, i32
  }
}

module attributes {stable_mosaic.version = 11 : i64} {
  func.func @_basic_block_kernel(%arg0: i32, %arg1: memref<1x8x128xbf16, #tpu.memory_space<vmem>>, %arg2: memref<9x8x8xbf16, #tpu.memory_space<vmem>>, %arg3: memref<8x1xf32, #tpu.memory_space<vmem>>, %arg4: memref<8x1xf32, #tpu.memory_space<vmem>>, %arg5: memref<9x8x8xbf16, #tpu.memory_space<vmem>>, %arg6: memref<8x1xf32, #tpu.memory_space<vmem>>, %arg7: memref<8x1xf32, #tpu.memory_space<vmem>>, %arg8: memref<78x128xbf16, #tpu.memory_space<vmem>>, %arg9: memref<78x128xbf16, #tpu.memory_space<vmem>>, %arg10: memref<1x8x128xbf16, #tpu.memory_space<vmem>>) attributes {dimension_semantics = [#tpu.dimension_semantics<parallel>], iteration_bounds = array<i64: 2>, scalar_prefetch = 0 : i64, scratch_operands = 0 : i64, tpu.core_type = #tpu.core_type<tc>, window_params = [{transform_indices = @transform_0, window_bounds = array<i64: 1, 8, 128>}, {pipeline_mode = #tpu.pipeline_mode<synchronous>, transform_indices = @transform_1, window_bounds = array<i64: 9, 8, 8>}, {pipeline_mode = #tpu.pipeline_mode<synchronous>, transform_indices = @transform_2, window_bounds = array<i64: 8, 1>}, {pipeline_mode = #tpu.pipeline_mode<synchronous>, transform_indices = @transform_3, window_bounds = array<i64: 8, 1>}, {pipeline_mode = #tpu.pipeline_mode<synchronous>, transform_indices = @transform_4, window_bounds = array<i64: 9, 8, 8>}, {pipeline_mode = #tpu.pipeline_mode<synchronous>, transform_indices = @transform_5, window_bounds = array<i64: 8, 1>}, {pipeline_mode = #tpu.pipeline_mode<synchronous>, transform_indices = @transform_6, window_bounds = array<i64: 8, 1>}, {pipeline_mode = #tpu.pipeline_mode<synchronous>, transform_indices = @transform_7, window_bounds = array<i64: 78, 128>}, {pipeline_mode = #tpu.pipeline_mode<synchronous>, transform_indices = @transform_8, window_bounds = array<i64: 78, 128>}, {transform_indices = @transform_9, window_bounds = array<i64: 1, 8, 128>}]} {
    %c0 = arith.constant 0 : index
    %c0_0 = arith.constant 0 : index
    %c0_1 = arith.constant 0 : index
    %0 = vector.load %arg1[%c0, %c0_0, %c0_1] : memref<1x8x128xbf16, #tpu.memory_space<vmem>>, vector<1x8x128xbf16>
    %1 = vector.shape_cast %0 : vector<1x8x128xbf16> to vector<8x128xbf16>
    %2 = vector.extract_strided_slice %1 {offsets = [0, 0], sizes = [8, 78], strides = [1, 1]} : vector<8x128xbf16> to vector<8x78xbf16>
    %c0_2 = arith.constant 0 : index
    %c0_3 = arith.constant 0 : index
    %c0_4 = arith.constant 0 : index
    %3 = vector.load %arg2[%c0_2, %c0_3, %c0_4] : memref<9x8x8xbf16, #tpu.memory_space<vmem>>, vector<1x8x8xbf16>
    %4 = vector.shape_cast %3 : vector<1x8x8xbf16> to vector<8x8xbf16>
    %cst = arith.constant dense<0.000000e+00> : vector<8x78xf32>
    %5 = tpu.matmul %4, %2, %cst {dimension_numbers = #tpu.dot_dimension_numbers<[1], [0], [0], [1], [0, 0, 1, 1], [], []>} : vector<8x8xbf16>, vector<8x78xbf16>, vector<8x78xf32> -> vector<8x78xf32>
    %6 = vector.extract_strided_slice %1 {offsets = [0, 1], sizes = [8, 78], strides = [1, 1]} : vector<8x128xbf16> to vector<8x78xbf16>
    %c1 = arith.constant 1 : index
    %c0_5 = arith.constant 0 : index
    %c0_6 = arith.constant 0 : index
    %7 = vector.load %arg2[%c1, %c0_5, %c0_6] : memref<9x8x8xbf16, #tpu.memory_space<vmem>>, vector<1x8x8xbf16>
    %8 = vector.shape_cast %7 : vector<1x8x8xbf16> to vector<8x8xbf16>
    %cst_7 = arith.constant dense<0.000000e+00> : vector<8x78xf32>
    %9 = tpu.matmul %8, %6, %cst_7 {dimension_numbers = #tpu.dot_dimension_numbers<[1], [0], [0], [1], [0, 0, 1, 1], [], []>} : vector<8x8xbf16>, vector<8x78xbf16>, vector<8x78xf32> -> vector<8x78xf32>
    %10 = arith.addf %5, %9 : vector<8x78xf32>
    %11 = vector.extract_strided_slice %1 {offsets = [0, 2], sizes = [8, 78], strides = [1, 1]} : vector<8x128xbf16> to vector<8x78xbf16>
    %c2 = arith.constant 2 : index
    %c0_8 = arith.constant 0 : index
    %c0_9 = arith.constant 0 : index
    %12 = vector.load %arg2[%c2, %c0_8, %c0_9] : memref<9x8x8xbf16, #tpu.memory_space<vmem>>, vector<1x8x8xbf16>
    %13 = vector.shape_cast %12 : vector<1x8x8xbf16> to vector<8x8xbf16>
    %cst_10 = arith.constant dense<0.000000e+00> : vector<8x78xf32>
    %14 = tpu.matmul %13, %11, %cst_10 {dimension_numbers = #tpu.dot_dimension_numbers<[1], [0], [0], [1], [0, 0, 1, 1], [], []>} : vector<8x8xbf16>, vector<8x78xbf16>, vector<8x78xf32> -> vector<8x78xf32>
    %15 = arith.addf %10, %14 : vector<8x78xf32>
    %16 = vector.extract_strided_slice %1 {offsets = [0, 10], sizes = [8, 78], strides = [1, 1]} : vector<8x128xbf16> to vector<8x78xbf16>
    %c3 = arith.constant 3 : index
    %c0_11 = arith.constant 0 : index
    %c0_12 = arith.constant 0 : index
    %17 = vector.load %arg2[%c3, %c0_11, %c0_12] : memref<9x8x8xbf16, #tpu.memory_space<vmem>>, vector<1x8x8xbf16>
    %18 = vector.shape_cast %17 : vector<1x8x8xbf16> to vector<8x8xbf16>
    %cst_13 = arith.constant dense<0.000000e+00> : vector<8x78xf32>
    %19 = tpu.matmul %18, %16, %cst_13 {dimension_numbers = #tpu.dot_dimension_numbers<[1], [0], [0], [1], [0, 0, 1, 1], [], []>} : vector<8x8xbf16>, vector<8x78xbf16>, vector<8x78xf32> -> vector<8x78xf32>
    %20 = arith.addf %15, %19 : vector<8x78xf32>
    %21 = vector.extract_strided_slice %1 {offsets = [0, 11], sizes = [8, 78], strides = [1, 1]} : vector<8x128xbf16> to vector<8x78xbf16>
    %c4 = arith.constant 4 : index
    %c0_14 = arith.constant 0 : index
    %c0_15 = arith.constant 0 : index
    %22 = vector.load %arg2[%c4, %c0_14, %c0_15] : memref<9x8x8xbf16, #tpu.memory_space<vmem>>, vector<1x8x8xbf16>
    %23 = vector.shape_cast %22 : vector<1x8x8xbf16> to vector<8x8xbf16>
    %cst_16 = arith.constant dense<0.000000e+00> : vector<8x78xf32>
    %24 = tpu.matmul %23, %21, %cst_16 {dimension_numbers = #tpu.dot_dimension_numbers<[1], [0], [0], [1], [0, 0, 1, 1], [], []>} : vector<8x8xbf16>, vector<8x78xbf16>, vector<8x78xf32> -> vector<8x78xf32>
    %25 = arith.addf %20, %24 : vector<8x78xf32>
    %26 = vector.extract_strided_slice %1 {offsets = [0, 12], sizes = [8, 78], strides = [1, 1]} : vector<8x128xbf16> to vector<8x78xbf16>
    %c5 = arith.constant 5 : index
    %c0_17 = arith.constant 0 : index
    %c0_18 = arith.constant 0 : index
    %27 = vector.load %arg2[%c5, %c0_17, %c0_18] : memref<9x8x8xbf16, #tpu.memory_space<vmem>>, vector<1x8x8xbf16>
    %28 = vector.shape_cast %27 : vector<1x8x8xbf16> to vector<8x8xbf16>
    %cst_19 = arith.constant dense<0.000000e+00> : vector<8x78xf32>
    %29 = tpu.matmul %28, %26, %cst_19 {dimension_numbers = #tpu.dot_dimension_numbers<[1], [0], [0], [1], [0, 0, 1, 1], [], []>} : vector<8x8xbf16>, vector<8x78xbf16>, vector<8x78xf32> -> vector<8x78xf32>
    %30 = arith.addf %25, %29 : vector<8x78xf32>
    %31 = vector.extract_strided_slice %1 {offsets = [0, 20], sizes = [8, 78], strides = [1, 1]} : vector<8x128xbf16> to vector<8x78xbf16>
    %c6 = arith.constant 6 : index
    %c0_20 = arith.constant 0 : index
    %c0_21 = arith.constant 0 : index
    %32 = vector.load %arg2[%c6, %c0_20, %c0_21] : memref<9x8x8xbf16, #tpu.memory_space<vmem>>, vector<1x8x8xbf16>
    %33 = vector.shape_cast %32 : vector<1x8x8xbf16> to vector<8x8xbf16>
    %cst_22 = arith.constant dense<0.000000e+00> : vector<8x78xf32>
    %34 = tpu.matmul %33, %31, %cst_22 {dimension_numbers = #tpu.dot_dimension_numbers<[1], [0], [0], [1], [0, 0, 1, 1], [], []>} : vector<8x8xbf16>, vector<8x78xbf16>, vector<8x78xf32> -> vector<8x78xf32>
    %35 = arith.addf %30, %34 : vector<8x78xf32>
    %36 = vector.extract_strided_slice %1 {offsets = [0, 21], sizes = [8, 78], strides = [1, 1]} : vector<8x128xbf16> to vector<8x78xbf16>
    %c7 = arith.constant 7 : index
    %c0_23 = arith.constant 0 : index
    %c0_24 = arith.constant 0 : index
    %37 = vector.load %arg2[%c7, %c0_23, %c0_24] : memref<9x8x8xbf16, #tpu.memory_space<vmem>>, vector<1x8x8xbf16>
    %38 = vector.shape_cast %37 : vector<1x8x8xbf16> to vector<8x8xbf16>
    %cst_25 = arith.constant dense<0.000000e+00> : vector<8x78xf32>
    %39 = tpu.matmul %38, %36, %cst_25 {dimension_numbers = #tpu.dot_dimension_numbers<[1], [0], [0], [1], [0, 0, 1, 1], [], []>} : vector<8x8xbf16>, vector<8x78xbf16>, vector<8x78xf32> -> vector<8x78xf32>
    %40 = arith.addf %35, %39 : vector<8x78xf32>
    %41 = vector.extract_strided_slice %1 {offsets = [0, 22], sizes = [8, 78], strides = [1, 1]} : vector<8x128xbf16> to vector<8x78xbf16>
    %c8 = arith.constant 8 : index
    %c0_26 = arith.constant 0 : index
    %c0_27 = arith.constant 0 : index
    %42 = vector.load %arg2[%c8, %c0_26, %c0_27] : memref<9x8x8xbf16, #tpu.memory_space<vmem>>, vector<1x8x8xbf16>
    %43 = vector.shape_cast %42 : vector<1x8x8xbf16> to vector<8x8xbf16>
    %cst_28 = arith.constant dense<0.000000e+00> : vector<8x78xf32>
    %44 = tpu.matmul %43, %41, %cst_28 {dimension_numbers = #tpu.dot_dimension_numbers<[1], [0], [0], [1], [0, 0, 1, 1], [], []>} : vector<8x8xbf16>, vector<8x78xbf16>, vector<8x78xf32> -> vector<8x78xf32>
    %45 = arith.addf %40, %44 : vector<8x78xf32>
    %c0_29 = arith.constant 0 : index
    %c0_30 = arith.constant 0 : index
    %46 = vector.load %arg3[%c0_29, %c0_30] : memref<8x1xf32, #tpu.memory_space<vmem>>, vector<8x1xf32>
    %47 = vector.broadcast %46 : vector<8x1xf32> to vector<8x78xf32>
    %48 = arith.mulf %45, %47 : vector<8x78xf32>
    %c0_31 = arith.constant 0 : index
    %c0_32 = arith.constant 0 : index
    %49 = vector.load %arg4[%c0_31, %c0_32] : memref<8x1xf32, #tpu.memory_space<vmem>>, vector<8x1xf32>
    %50 = vector.broadcast %49 : vector<8x1xf32> to vector<8x78xf32>
    %51 = arith.addf %48, %50 : vector<8x78xf32>
    %cst_33 = arith.constant 0.000000e+00 : f32
    %52 = vector.broadcast %cst_33 : f32 to vector<8x78xf32>
    %53 = arith.maximumf %51, %52 : vector<8x78xf32>
    %54 = arith.truncf %53 : vector<8x78xf32> to vector<8x78xbf16>
    %c0_34 = arith.constant 0 : index
    %c0_35 = arith.constant 0 : index
    %55 = vector.load %arg8[%c0_34, %c0_35] : memref<78x128xbf16, #tpu.memory_space<vmem>>, vector<78x128xbf16>
    %cst_36 = arith.constant dense<0.000000e+00> : vector<8x128xf32>
    %56 = tpu.matmul %54, %55, %cst_36 {dimension_numbers = #tpu.dot_dimension_numbers<[1], [0], [0], [1], [0, 0, 1, 1], [], []>} : vector<8x78xbf16>, vector<78x128xbf16>, vector<8x128xf32> -> vector<8x128xf32>
    %57 = arith.truncf %56 : vector<8x128xf32> to vector<8x128xbf16>
    %58 = vector.extract_strided_slice %57 {offsets = [0, 0], sizes = [8, 78], strides = [1, 1]} : vector<8x128xbf16> to vector<8x78xbf16>
    %c0_37 = arith.constant 0 : index
    %c0_38 = arith.constant 0 : index
    %c0_39 = arith.constant 0 : index
    %59 = vector.load %arg5[%c0_37, %c0_38, %c0_39] : memref<9x8x8xbf16, #tpu.memory_space<vmem>>, vector<1x8x8xbf16>
    %60 = vector.shape_cast %59 : vector<1x8x8xbf16> to vector<8x8xbf16>
    %cst_40 = arith.constant dense<0.000000e+00> : vector<8x78xf32>
    %61 = tpu.matmul %60, %58, %cst_40 {dimension_numbers = #tpu.dot_dimension_numbers<[1], [0], [0], [1], [0, 0, 1, 1], [], []>} : vector<8x8xbf16>, vector<8x78xbf16>, vector<8x78xf32> -> vector<8x78xf32>
    %62 = vector.extract_strided_slice %57 {offsets = [0, 1], sizes = [8, 78], strides = [1, 1]} : vector<8x128xbf16> to vector<8x78xbf16>
    %c1_41 = arith.constant 1 : index
    %c0_42 = arith.constant 0 : index
    %c0_43 = arith.constant 0 : index
    %63 = vector.load %arg5[%c1_41, %c0_42, %c0_43] : memref<9x8x8xbf16, #tpu.memory_space<vmem>>, vector<1x8x8xbf16>
    %64 = vector.shape_cast %63 : vector<1x8x8xbf16> to vector<8x8xbf16>
    %cst_44 = arith.constant dense<0.000000e+00> : vector<8x78xf32>
    %65 = tpu.matmul %64, %62, %cst_44 {dimension_numbers = #tpu.dot_dimension_numbers<[1], [0], [0], [1], [0, 0, 1, 1], [], []>} : vector<8x8xbf16>, vector<8x78xbf16>, vector<8x78xf32> -> vector<8x78xf32>
    %66 = arith.addf %61, %65 : vector<8x78xf32>
    %67 = vector.extract_strided_slice %57 {offsets = [0, 2], sizes = [8, 78], strides = [1, 1]} : vector<8x128xbf16> to vector<8x78xbf16>
    %c2_45 = arith.constant 2 : index
    %c0_46 = arith.constant 0 : index
    %c0_47 = arith.constant 0 : index
    %68 = vector.load %arg5[%c2_45, %c0_46, %c0_47] : memref<9x8x8xbf16, #tpu.memory_space<vmem>>, vector<1x8x8xbf16>
    %69 = vector.shape_cast %68 : vector<1x8x8xbf16> to vector<8x8xbf16>
    %cst_48 = arith.constant dense<0.000000e+00> : vector<8x78xf32>
    %70 = tpu.matmul %69, %67, %cst_48 {dimension_numbers = #tpu.dot_dimension_numbers<[1], [0], [0], [1], [0, 0, 1, 1], [], []>} : vector<8x8xbf16>, vector<8x78xbf16>, vector<8x78xf32> -> vector<8x78xf32>
    %71 = arith.addf %66, %70 : vector<8x78xf32>
    %72 = vector.extract_strided_slice %57 {offsets = [0, 10], sizes = [8, 78], strides = [1, 1]} : vector<8x128xbf16> to vector<8x78xbf16>
    %c3_49 = arith.constant 3 : index
    %c0_50 = arith.constant 0 : index
    %c0_51 = arith.constant 0 : index
    %73 = vector.load %arg5[%c3_49, %c0_50, %c0_51] : memref<9x8x8xbf16, #tpu.memory_space<vmem>>, vector<1x8x8xbf16>
    %74 = vector.shape_cast %73 : vector<1x8x8xbf16> to vector<8x8xbf16>
    %cst_52 = arith.constant dense<0.000000e+00> : vector<8x78xf32>
    %75 = tpu.matmul %74, %72, %cst_52 {dimension_numbers = #tpu.dot_dimension_numbers<[1], [0], [0], [1], [0, 0, 1, 1], [], []>} : vector<8x8xbf16>, vector<8x78xbf16>, vector<8x78xf32> -> vector<8x78xf32>
    %76 = arith.addf %71, %75 : vector<8x78xf32>
    %77 = vector.extract_strided_slice %57 {offsets = [0, 11], sizes = [8, 78], strides = [1, 1]} : vector<8x128xbf16> to vector<8x78xbf16>
    %c4_53 = arith.constant 4 : index
    %c0_54 = arith.constant 0 : index
    %c0_55 = arith.constant 0 : index
    %78 = vector.load %arg5[%c4_53, %c0_54, %c0_55] : memref<9x8x8xbf16, #tpu.memory_space<vmem>>, vector<1x8x8xbf16>
    %79 = vector.shape_cast %78 : vector<1x8x8xbf16> to vector<8x8xbf16>
    %cst_56 = arith.constant dense<0.000000e+00> : vector<8x78xf32>
    %80 = tpu.matmul %79, %77, %cst_56 {dimension_numbers = #tpu.dot_dimension_numbers<[1], [0], [0], [1], [0, 0, 1, 1], [], []>} : vector<8x8xbf16>, vector<8x78xbf16>, vector<8x78xf32> -> vector<8x78xf32>
    %81 = arith.addf %76, %80 : vector<8x78xf32>
    %82 = vector.extract_strided_slice %57 {offsets = [0, 12], sizes = [8, 78], strides = [1, 1]} : vector<8x128xbf16> to vector<8x78xbf16>
    %c5_57 = arith.constant 5 : index
    %c0_58 = arith.constant 0 : index
    %c0_59 = arith.constant 0 : index
    %83 = vector.load %arg5[%c5_57, %c0_58, %c0_59] : memref<9x8x8xbf16, #tpu.memory_space<vmem>>, vector<1x8x8xbf16>
    %84 = vector.shape_cast %83 : vector<1x8x8xbf16> to vector<8x8xbf16>
    %cst_60 = arith.constant dense<0.000000e+00> : vector<8x78xf32>
    %85 = tpu.matmul %84, %82, %cst_60 {dimension_numbers = #tpu.dot_dimension_numbers<[1], [0], [0], [1], [0, 0, 1, 1], [], []>} : vector<8x8xbf16>, vector<8x78xbf16>, vector<8x78xf32> -> vector<8x78xf32>
    %86 = arith.addf %81, %85 : vector<8x78xf32>
    %87 = vector.extract_strided_slice %57 {offsets = [0, 20], sizes = [8, 78], strides = [1, 1]} : vector<8x128xbf16> to vector<8x78xbf16>
    %c6_61 = arith.constant 6 : index
    %c0_62 = arith.constant 0 : index
    %c0_63 = arith.constant 0 : index
    %88 = vector.load %arg5[%c6_61, %c0_62, %c0_63] : memref<9x8x8xbf16, #tpu.memory_space<vmem>>, vector<1x8x8xbf16>
    %89 = vector.shape_cast %88 : vector<1x8x8xbf16> to vector<8x8xbf16>
    %cst_64 = arith.constant dense<0.000000e+00> : vector<8x78xf32>
    %90 = tpu.matmul %89, %87, %cst_64 {dimension_numbers = #tpu.dot_dimension_numbers<[1], [0], [0], [1], [0, 0, 1, 1], [], []>} : vector<8x8xbf16>, vector<8x78xbf16>, vector<8x78xf32> -> vector<8x78xf32>
    %91 = arith.addf %86, %90 : vector<8x78xf32>
    %92 = vector.extract_strided_slice %57 {offsets = [0, 21], sizes = [8, 78], strides = [1, 1]} : vector<8x128xbf16> to vector<8x78xbf16>
    %c7_65 = arith.constant 7 : index
    %c0_66 = arith.constant 0 : index
    %c0_67 = arith.constant 0 : index
    %93 = vector.load %arg5[%c7_65, %c0_66, %c0_67] : memref<9x8x8xbf16, #tpu.memory_space<vmem>>, vector<1x8x8xbf16>
    %94 = vector.shape_cast %93 : vector<1x8x8xbf16> to vector<8x8xbf16>
    %cst_68 = arith.constant dense<0.000000e+00> : vector<8x78xf32>
    %95 = tpu.matmul %94, %92, %cst_68 {dimension_numbers = #tpu.dot_dimension_numbers<[1], [0], [0], [1], [0, 0, 1, 1], [], []>} : vector<8x8xbf16>, vector<8x78xbf16>, vector<8x78xf32> -> vector<8x78xf32>
    %96 = arith.addf %91, %95 : vector<8x78xf32>
    %97 = vector.extract_strided_slice %57 {offsets = [0, 22], sizes = [8, 78], strides = [1, 1]} : vector<8x128xbf16> to vector<8x78xbf16>
    %c8_69 = arith.constant 8 : index
    %c0_70 = arith.constant 0 : index
    %c0_71 = arith.constant 0 : index
    %98 = vector.load %arg5[%c8_69, %c0_70, %c0_71] : memref<9x8x8xbf16, #tpu.memory_space<vmem>>, vector<1x8x8xbf16>
    %99 = vector.shape_cast %98 : vector<1x8x8xbf16> to vector<8x8xbf16>
    %cst_72 = arith.constant dense<0.000000e+00> : vector<8x78xf32>
    %100 = tpu.matmul %99, %97, %cst_72 {dimension_numbers = #tpu.dot_dimension_numbers<[1], [0], [0], [1], [0, 0, 1, 1], [], []>} : vector<8x8xbf16>, vector<8x78xbf16>, vector<8x78xf32> -> vector<8x78xf32>
    %101 = arith.addf %96, %100 : vector<8x78xf32>
    %c0_73 = arith.constant 0 : index
    %c0_74 = arith.constant 0 : index
    %102 = vector.load %arg6[%c0_73, %c0_74] : memref<8x1xf32, #tpu.memory_space<vmem>>, vector<8x1xf32>
    %103 = vector.broadcast %102 : vector<8x1xf32> to vector<8x78xf32>
    %104 = arith.mulf %101, %103 : vector<8x78xf32>
    %c0_75 = arith.constant 0 : index
    %c0_76 = arith.constant 0 : index
    %105 = vector.load %arg7[%c0_75, %c0_76] : memref<8x1xf32, #tpu.memory_space<vmem>>, vector<8x1xf32>
    %106 = vector.broadcast %105 : vector<8x1xf32> to vector<8x78xf32>
    %107 = arith.addf %104, %106 : vector<8x78xf32>
    %108 = vector.extract_strided_slice %1 {offsets = [0, 11], sizes = [8, 78], strides = [1, 1]} : vector<8x128xbf16> to vector<8x78xbf16>
    %109 = arith.extf %108 : vector<8x78xbf16> to vector<8x78xf32>
    %110 = arith.addf %107, %109 : vector<8x78xf32>
    %cst_77 = arith.constant 0.000000e+00 : f32
    %111 = vector.broadcast %cst_77 : f32 to vector<8x78xf32>
    %112 = arith.maximumf %110, %111 : vector<8x78xf32>
    %113 = arith.truncf %112 : vector<8x78xf32> to vector<8x78xbf16>
    %c0_78 = arith.constant 0 : index
    %c0_79 = arith.constant 0 : index
    %114 = vector.load %arg9[%c0_78, %c0_79] : memref<78x128xbf16, #tpu.memory_space<vmem>>, vector<78x128xbf16>
    %cst_80 = arith.constant dense<0.000000e+00> : vector<8x128xf32>
    %115 = tpu.matmul %113, %114, %cst_80 {dimension_numbers = #tpu.dot_dimension_numbers<[1], [0], [0], [1], [0, 0, 1, 1], [], []>} : vector<8x78xbf16>, vector<78x128xbf16>, vector<8x128xf32> -> vector<8x128xf32>
    %116 = arith.truncf %115 : vector<8x128xf32> to vector<8x128xbf16>
    %c0_81 = arith.constant 0 : index
    %c0_82 = arith.constant 0 : index
    %c0_83 = arith.constant 0 : index
    %117 = vector.load %arg10[%c0_81, %c0_82, %c0_83] : memref<1x8x128xbf16, #tpu.memory_space<vmem>>, vector<1x8x128xbf16>
    %118 = vector.shape_cast %117 : vector<1x8x128xbf16> to vector<8x128xbf16>
    %119 = vector.shape_cast %116 : vector<8x128xbf16> to vector<1x8x128xbf16>
    tpu.vector_store %arg10[%c0_81, %c0_82, %c0_83], %119 {strides = array<i32>} : memref<1x8x128xbf16, #tpu.memory_space<vmem>>, vector<1x8x128xbf16>,
    return
  }
  func.func @transform_0(%arg0: i32) -> (i32, i32, i32) {
    %c0_i32 = arith.constant 0 : i32
    %c0_i32_0 = arith.constant 0 : i32
    %c0_i32_1 = arith.constant 0 : i32
    return %arg0, %c0_i32, %c0_i32_0 : i32, i32, i32
  }
  func.func @transform_1(%arg0: i32) -> (i32, i32, i32) {
    %c0_i32 = arith.constant 0 : i32
    %c0_i32_0 = arith.constant 0 : i32
    %c0_i32_1 = arith.constant 0 : i32
    %c0_i32_2 = arith.constant 0 : i32
    return %c0_i32, %c0_i32_0, %c0_i32_1 : i32, i32, i32
  }
  func.func @transform_2(%arg0: i32) -> (i32, i32) {
    %c0_i32 = arith.constant 0 : i32
    %c0_i32_0 = arith.constant 0 : i32
    %c0_i32_1 = arith.constant 0 : i32
    return %c0_i32, %c0_i32_0 : i32, i32
  }
  func.func @transform_3(%arg0: i32) -> (i32, i32) {
    %c0_i32 = arith.constant 0 : i32
    %c0_i32_0 = arith.constant 0 : i32
    %c0_i32_1 = arith.constant 0 : i32
    return %c0_i32, %c0_i32_0 : i32, i32
  }
  func.func @transform_4(%arg0: i32) -> (i32, i32, i32) {
    %c0_i32 = arith.constant 0 : i32
    %c0_i32_0 = arith.constant 0 : i32
    %c0_i32_1 = arith.constant 0 : i32
    %c0_i32_2 = arith.constant 0 : i32
    return %c0_i32, %c0_i32_0, %c0_i32_1 : i32, i32, i32
  }
  func.func @transform_5(%arg0: i32) -> (i32, i32) {
    %c0_i32 = arith.constant 0 : i32
    %c0_i32_0 = arith.constant 0 : i32
    %c0_i32_1 = arith.constant 0 : i32
    return %c0_i32, %c0_i32_0 : i32, i32
  }
  func.func @transform_6(%arg0: i32) -> (i32, i32) {
    %c0_i32 = arith.constant 0 : i32
    %c0_i32_0 = arith.constant 0 : i32
    %c0_i32_1 = arith.constant 0 : i32
    return %c0_i32, %c0_i32_0 : i32, i32
  }
  func.func @transform_7(%arg0: i32) -> (i32, i32) {
    %c0_i32 = arith.constant 0 : i32
    %c0_i32_0 = arith.constant 0 : i32
    %c0_i32_1 = arith.constant 0 : i32
    return %c0_i32, %c0_i32_0 : i32, i32
  }
  func.func @transform_8(%arg0: i32) -> (i32, i32) {
    %c0_i32 = arith.constant 0 : i32
    %c0_i32_0 = arith.constant 0 : i32
    %c0_i32_1 = arith.constant 0 : i32
    return %c0_i32, %c0_i32_0 : i32, i32
  }
  func.func @transform_9(%arg0: i32) -> (i32, i32, i32) {
    %c0_i32 = arith.constant 0 : i32
    %c0_i32_0 = arith.constant 0 : i32
    %c0_i32_1 = arith.constant 0 : i32
    return %arg0, %c0_i32, %c0_i32_0 : i32, i32, i32
  }
}

</mosaic_0001>

<bundles_post_ra>
// kernel: _lambda_.3
= control target key start
LH: loop header
LB: loop body
LE: loop exit
PB: predicated region body
PF: predicated region fallthrough
CT: control target
= control target key end

     0   :  { %s1851_s30 = smov 0   ;;  %s2102_s0 = inlined_call_operand.vmem [shape: bf16[2,8,128], index: 0, kind: input, shape index: {}]   ;;  %s2103_s1 = inlined_call_operand.vmem [shape: bf16[9,8,8], index: 1, kind: input, shape index: {}]   ;;  %s2104_s2 = inlined_call_operand.vmem [shape: f32[8,1], index: 2, kind: input, shape index: {}, may-alias: {2,5}]   ;;  %s2105_s3 = inlined_call_operand.vmem [shape: f32[8,1], index: 3, kind: input, shape index: {}, may-alias: {3,6}]   ;;  %s2106_s4 = inlined_call_operand.vmem [shape: bf16[9,8,8], index: 4, kind: input, shape index: {}]   ;;  %s2107_s5 = inlined_call_operand.vmem [shape: f32[8,1], index: 5, kind: input, shape index: {}, may-alias: {2,5}]   ;;  %s2108_s6 = inlined_call_operand.vmem [shape: f32[8,1], index: 6, kind: input, shape index: {}, may-alias: {3,6}]   ;;  %s2109_s7 = inlined_call_operand.vmem [shape: bf16[78,128], index: 7, kind: input, shape index: {}, may-alias: {7,8}]   ;;  %s2110_s8 = inlined_call_operand.vmem [shape: bf16[78,128], index: 8, kind: input, shape index: {}, may-alias: {7,8}]   ;;  %s2111_s9 = inlined_call_operand.vmem [shape: bf16[2,8,128], index: 9, kind: output, shape index: {}]  }
   0x1 LB: > { %s1510_s10 = sadd.s32 4294967295, %s1788_s30   ;;  %p1514_p0 = scmp.ge.s32.totalorder %s1788_s30, 1  ;;  %s1788_s30 = sphi %s1851_s30, %s19_s30  }
   0x2   : > { %p286_p1 = scmp.lt.s32.totalorder %s1788_s30, 3 }
   0x4   : > { %p287_p2 = pnand %p1514_p0, %p286_p1 }
   0x5   : > { %p320_p3 = scmp.lt.s32.totalorder (!%p287_p2), %s1510_s10, 1  ;;  %s1792_s15 = smov (!%p287_p2), 127  }
   0x6   : > { %290 = sbr.rel (%p287_p2) target bundleno = 1125 (0x465), region = 56  ;;  %s1793_s16 = smov (!%p287_p2), 118  }
   0x7   : > { %s1794_s17 = smov (!%p287_p2), 126   ;;  %s1795_s18 = smov (!%p287_p2), 117  }
   0x8   : > { %s1796_s19 = smov (!%p287_p2), 108   ;;  %s1797_s20 = smov (!%p287_p2), 116  }
   0x9   : > { %s1798_s21 = smov (!%p287_p2), 106   ;;  %s1799_s22 = smov (!%p287_p2), 107  }
   0xb   : > { %v1790_v0 = vmov 0.0   ;;  %vm1791_vm0 = vmmov 0   ;;  %s2113_s10 = smov (!%p320_p3, %s1510_s10), 1  ;;  %v789_v3 = vld [vmem:[%s2104_s2] sm:$0xff]  ;;  %v1800_v5 = vmov 0   ;;  %vm342_vm1 = vcmask 1043456  }
   0xc   : > { %1614 = vmatprep.subr.bf16.mxu1 %v1790_v0  ;;  %1616 = vmatprep.mubr.msk.bf16.mxu1 %vm1791_vm0, %v1790_v0  ;;  %s1515_s11 = sshll.u32 %s2113_s10, 2  ;;  %v796_v4 = vld [vmem:[%s2105_s3] sm:$0xff]  ;;  %vm338_vm2 = vcmask 64512   ;;  %v1521_v14 = vld [vmem:[%s2103_s1 + $0x8] sm:$0xf]  ;;  %vm848_vm3 = vcmask 1046528  }
   0xd   : > { %1626 = vmatprep.subr.bf16.mxu0 %v1790_v0  ;;  %1628 = vmatprep.mubr.msk.bf16.mxu0 %vm1791_vm0, %v1790_v0  ;;  %s323_s14 = scalar_lea.vmem %s2102_s0, %s1515_s11  ;;  %v1517_v9 = vld [vmem:[%s2103_s1 + $0x4] sm:$0xf]  ;;  %v330_v16 = vld [vmem:[%s2103_s1] sm:$0xf]  ;;  %v1525_v19 = vld [vmem:[%s2103_s1 + $0x10] sm:$0xf]  ;;  %s327_s23 = scalar_lea.vmem %s2111_s9, %s1515_s11 }
   0xe   : > { %v1873_v1 = vld [vmem:[%s323_s14] sm:$0xf]  ;;  %1769 = vset.pattern.permute.xlu0 %v1800_v5  ;;  %1770 = vset.pattern.permute.xlu1 %v1800_v5  ;;  %v1523_v22 = vld [vmem:[%s2103_s1 + $0xc] sm:$0xf]  ;;  %v1529_v25 = vld [vmem:[%s2103_s1 + $0x18] sm:$0xf] }
   0xf   : > { %v1518_v2 = vcombine.low %v1873_v1, %v1873_v1  ;;  %v390_v10 = vsel %vm342_vm1, %v1873_v1, 0  ;;  %v1527_v28 = vld [vmem:[%s2103_s1 + $0x14] sm:$0xf]  ;;  %v1533_v30 = vld [vmem:[%s2103_s1 + $0x20] sm:$0xf]  ;;  %v1773_v34 = vld [vmem:[%s2109_s7 + $0x18] sm:$0xff]  }
  0x10   : > { %v1531_v31 = vld [vmem:[%s2103_s1 + $0x1c] sm:$0xf]  ;;  %v1772_v32 = vld [vmem:[%s2109_s7 + $0x20] sm:$0x7f]   ;;  %v1774_v35 = vld [vmem:[%s2109_s7 + $0x10] sm:$0xff]   ;;  %vm844_vm4 = vcmask 637952  }
  0x11   : > { %336 = vrot.lane.b32.xlu0 %v1518_v2, %s1792_s15  ;;  %485 = vrot.lane.b32.xlu1 %v1518_v2, %s1793_s16  ;;  %v850_v33 = vsel %vm848_vm3, %v1772_v32, 0  ;;  %v1775_v36 = vld [vmem:[%s2109_s7 + $0x8] sm:$0xff]   ;;  %v1776_v37 = vld [vmem:[%s2109_s7] sm:$0xff]  }
  0x12   : > { %v1348_v32 = vld [vmem:[%s2107_s5] sm:$0xff] }
  0x15   : > { %434 = vrot.lane.b32.xlu0 %v1518_v2, %s1794_s17  ;;  %536 = vrot.lane.b32.xlu1 %v1518_v2, %s1795_s18 }
  0x19   : > { %638 = vrot.lane.b32.xlu1 %v1518_v2, %s1796_s19  ;;  %587 = vrot.lane.b32.xlu0 %v1518_v2, %s1797_s20 }
  0x1d   : > { %740 = vrot.lane.b32.xlu1 %v1518_v2, %s1798_s21  ;;  %689 = vrot.lane.b32.xlu0 %v1518_v2, %s1799_s22 }
  0x21   : > { %792 = vperm.xlu0 %1769, %v789_v3   ;;  %799 = vperm.xlu1 %1770, %v796_v4  }
  0x83   : > { %v337_v6 = vpop.permute.xlu0 %336  ;;  %v486_v7 = vpop.permute.xlu1 %485 }
  0x84   : > { %v344_v8 = vsel %vm342_vm1, %v337_v6, 0  ;;  %v491_v17 = vsel %vm342_vm1, %v486_v7, 0 }
  0x85   : > { %1615 = vmatpush3.bf16.msra.mxu1 %v344_v8 }
  0x86   : > { %1620 = vmatprep.subr.bf16.mxu1 %v1790_v0 }
  0x87   : > { %v435_v11 = vpop.permute.xlu0 %434  ;;  %v537_v12 = vpop.permute.xlu1 %536 }
  0x88   : > { %1617 = vmatmul.mubr.msk.bf16.vlgmr.msra.gmra.mxu1 %vm338_vm2, %v1517_v9  ;;  %v440_v13 = vsel %vm342_vm1, %v435_v11, 0  ;;  %v542_v15 = vsel %vm342_vm1, %v537_v12, 0 }
  0x89   : > { %1627 = vmatpush3.bf16.msra.mxu0 %v440_v13  ;;  %1621 = vmatpush3.bf16.msra.mxu1 %v390_v10 }
  0x8a   : > { %1622 = vmatprep.mubr.msk.bf16.mxu1 %vm1791_vm0, %v1790_v0  ;;  %1638 = vmatprep.subr.bf16.mxu0 %v1790_v0 }
  0x8b   : > { %1632 = vmatprep.subr.bf16.mxu1 %v1790_v0  ;;  %v639_v18 = vpop.permute.xlu1 %638  ;;  %v588_v21 = vpop.permute.xlu0 %587 }
  0x8c   : > { %1629 = vmatmul.mubr.msk.bf16.vlgmr.msra.gmra.mxu0 %vm338_vm2, %v1521_v14  ;;  %v644_v20 = vsel %vm342_vm1, %v639_v18, 0  ;;  %v593_v23 = vsel %vm342_vm1, %v588_v21, 0 }
  0x8d   : > { %1639 = vmatpush3.bf16.msra.mxu0 %v542_v15  ;;  %1640 = vmatprep.mubr.msk.bf16.mxu0 %vm1791_vm0, %v1790_v0 }
  0x8e   : > { %1650 = vmatprep.subr.bf16.mxu0 %v1790_v0 }
  0x8f   : > { %v741_v24 = vpop.permute.xlu1 %740  ;;  %v690_v27 = vpop.permute.xlu0 %689 }
  0x90   : > { %1623 = vmatmul.mubr.msk.bf16.vlgmr.msra.gmra.mxu1 %vm338_vm2, %v330_v16  ;;  %v746_v26 = vsel %vm342_vm1, %v741_v24, 0  ;;  %v695_v29 = vsel %vm342_vm1, %v690_v27, 0 }
  0x91   : > { %1633 = vmatpush3.bf16.msra.mxu1 %v491_v17  ;;  %1634 = vmatprep.mubr.msk.bf16.mxu1 %vm1791_vm0, %v1790_v0 }
  0x92   : > { %1644 = vmatprep.subr.bf16.mxu1 %v1790_v0 }
  0x94   : > { %1641 = vmatmul.mubr.msk.bf16.vlgmr.msra.gmra.mxu0 %vm338_vm2, %v1525_v19 }
  0x95   : > { %1651 = vmatpush3.bf16.msra.mxu0 %v644_v20  ;;  %1652 = vmatprep.mubr.msk.bf16.mxu0 %vm1791_vm0, %v1790_v0 }
  0x96   : > { %1662 = vmatprep.subr.bf16.mxu0 %v1790_v0 }
  0x98   : > { %1635 = vmatmul.mubr.msk.bf16.vlgmr.msra.gmra.mxu1 %vm338_vm2, %v1523_v22 }
  0x99   : > { %1645 = vmatpush3.bf16.msra.mxu1 %v593_v23  ;;  %1646 = vmatprep.mubr.msk.bf16.mxu1 %vm1791_vm0, %v1790_v0 }
  0x9a   : > { %1656 = vmatprep.subr.bf16.mxu1 %v1790_v0 }
  0x9c   : > { %1653 = vmatmul.mubr.msk.bf16.vlgmr.msra.gmra.mxu0 %vm338_vm2, %v1529_v25  ;;  %v793_v15 = vpop.permute.xlu0 %792  ;;  %v800_v20 = vpop.permute.xlu1 %799 }
  0x9d   : > { %1663 = vmatpush3.bf16.msra.mxu0 %v746_v26  ;;  %1664 = vmatprep.mubr.msk.bf16.mxu0 %vm1791_vm0, %v1790_v0 }
  0x9e   : > { %1682 = vmatprep.subr.bf16.mxu0 %v1790_v0 }
  0xa0   : > { %1647 = vmatmul.mubr.msk.bf16.vlgmr.msra.gmra.mxu1 %vm338_vm2, %v1527_v28 }
  0xa1   : > { %1657 = vmatpush3.bf16.msra.mxu1 %v695_v29  ;;  %1658 = vmatprep.mubr.msk.bf16.mxu1 %vm1791_vm0, %v1790_v0 }
  0xa2   : > { %1668 = vmatprep.subr.bf16.mxu1 %v1790_v0 }
  0xa4   : > { %1665 = vmatmul.mubr.msk.bf16.vlgmr.msra.gmra.mxu0 %vm338_vm2, %v1533_v30 }
  0xa5   : > { %1684 = vmatprep.mubr.msk.bf16.mxu0 %vm1791_vm0, %v1790_v0 }
  0xa8   : > { %1659 = vmatmul.mubr.msk.bf16.vlgmr.msra.gmra.mxu1 %vm338_vm2, %v1531_v31  ;;  %v1355_v31 = vld [vmem:[%s2108_s6] sm:$0xff] }
  0xa9   : > { %1678 = vmatprep.mubr.msk.bf16.mxu1 %vm1791_vm0, %v1790_v0  ;;  %1669 = vmatpush3.bf16.msra.mxu1 %v850_v33  ;;  %v1362_v33 = vunpack.c.l.bf16 %v1873_v1 }
  0xaa   : > { %1670 = vmatprep.subr.bf16.mxu1 %v1790_v0 }
  0xad   : > { %1671 = vmatpush3.bf16.msra.mxu1 %v1773_v34 }
  0xae   : > { %1672 = vmatprep.subr.bf16.mxu1 %v1790_v0 }
  0xb1   : > { %1673 = vmatpush3.bf16.msra.mxu1 %v1774_v35 }
  0xb2   : > { %1674 = vmatprep.subr.bf16.mxu1 %v1790_v0 }
  0xb5   : > { %1675 = vmatpush3.bf16.msra.mxu1 %v1775_v36 }
  0xb6   : > { %1676 = vmatprep.subr.bf16.mxu1 %v1790_v0 }
  0xb9   : > { %1677 = vmatpush3.bf16.msra.mxu1 %v1776_v37 }
  0xba   : > { %1694 = vmatprep.subr.bf16.mxu1 %v1790_v0 }
 0x148   : > { %v380_v38 = vpop.f32.mrf.mxu1 }
 0x14a   : > { %v1618_v39 = vpop.f32.mrf.mxu1 }
 0x14b   : > { %v1544_v39 = vld [vmem:[%s2106_s4 + $0x8] sm:$0xf] }
 0x14c   : > { %v383_v40 = vpop.f32.mrf.mxu1  ;;  %v476_v41 = vpop.f32.mrf.mxu0 }
 0x14e   : > { %v1619_v42 = vpop.f32.mrf.mxu1  ;;  %v1630_v43 = vpop.f32.mrf.mxu0 }
 0x150   : > { %v426_v44 = vpop.f32.mrf.mxu1  ;;  %v479_v45 = vpop.f32.mrf.mxu0 }
 0x151   : > { %v427_v52 = vadd.f32 %v426_v44, %v380_v38  ;;  %v1541_v38 = vld [vmem:[%s2106_s4 + $0x4] sm:$0xf]  ;;  %v893_v44 = vld [vmem:[%s2106_s4] sm:$0xf]  ;;  %v1548_v45 = vld [vmem:[%s2106_s4 + $0x10] sm:$0xf] }
 0x152   : > { %v1624_v46 = vpop.f32.mrf.mxu1  ;;  %v1631_v47 = vpop.f32.mrf.mxu0 }
 0x153   : > { %v482_v57 = vadd.f32 %v476_v41, %v427_v52 }
 0x154   : > { %v429_v48 = vpop.f32.mrf.mxu1  ;;  %v578_v49 = vpop.f32.mrf.mxu0 }
 0x156   : > { %v1625_v50 = vpop.f32.mrf.mxu1  ;;  %v1642_v51 = vpop.f32.mrf.mxu0 }
 0x157   : > { %v1546_v50 = vld [vmem:[%s2106_s4 + $0xc] sm:$0xf]  ;;  %v1552_v51 = vld [vmem:[%s2106_s4 + $0x18] sm:$0xf] }
 0x158   : > { %v527_v53 = vpop.f32.mrf.mxu1  ;;  %v581_v54 = vpop.f32.mrf.mxu0 }
 0x159   : > { %v533_v60 = vadd.f32 %v527_v53, %v482_v57 }
 0x15a   : > { %v1636_v55 = vpop.f32.mrf.mxu1  ;;  %v1643_v56 = vpop.f32.mrf.mxu0 }
 0x15b   : > { %v584_v3 = vadd.f32 %v578_v49, %v533_v60  ;;  %v1550_v55 = vld [vmem:[%s2106_s4 + $0x14] sm:$0xf]  ;;  %v1556_v56 = vld [vmem:[%s2106_s4 + $0x20] sm:$0xf] }
 0x15c   : > { %v530_v58 = vpop.f32.mrf.mxu1  ;;  %v680_v59 = vpop.f32.mrf.mxu0 }
 0x15d   : > { %v1554_v58 = vld [vmem:[%s2106_s4 + $0x1c] sm:$0xf] }
 0x15e   : > { %v1637_v61 = vpop.f32.mrf.mxu1  ;;  %v1654_v62 = vpop.f32.mrf.mxu0 }
 0x15f   : > { %v1778_v61 = vld [vmem:[%s2110_s8 + $0x18] sm:$0xff]   ;;  %v1779_v62 = vld [vmem:[%s2110_s8 + $0x10] sm:$0xff]  }
 0x160   : > { %v629_v63 = vpop.f32.mrf.mxu1  ;;  %v683_v2 = vpop.f32.mrf.mxu0 }
 0x161   : > { %v635_v6 = vadd.f32 %v629_v63, %v584_v3  ;;  %v1780_v63 = vld [vmem:[%s2110_s8 + $0x8] sm:$0xff]   ;;  %v1781_v2 = vld [vmem:[%s2110_s8] sm:$0xff]  }
 0x162   : > { %v1648_v4 = vpop.f32.mrf.mxu1  ;;  %v1655_v5 = vpop.f32.mrf.mxu0 }
 0x163   : > { %v686_v11 = vadd.f32 %v680_v59, %v635_v6  ;;  %v1777_v59 = vld [vmem:[%s2110_s8 + $0x20] sm:$0x7f]  }
 0x164   : > { %v632_v7 = vpop.f32.mrf.mxu1  ;;  %v782_v8 = vpop.f32.mrf.mxu0  ;;  %v1413_v60 = vsel %vm848_vm3, %v1777_v59, 0 }
 0x166   : > { %v1649_v9 = vpop.f32.mrf.mxu1  ;;  %v1666_v10 = vpop.f32.mrf.mxu0 }
 0x168   : > { %v731_v12 = vpop.f32.mrf.mxu1  ;;  %v785_v13 = vpop.f32.mrf.mxu0 }
 0x169   : > { %v737_v14 = vadd.f32 %v731_v12, %v686_v11 }
 0x16a   : > { %v1660_v16 = vpop.f32.mrf.mxu1  ;;  %v1667_v17 = vpop.f32.mrf.mxu0 }
 0x16b   : > { %v788_v18 = vadd.f32 %v782_v8, %v737_v14 }
 0x16c   : > { %v734_v19 = vpop.f32.mrf.mxu1 }
 0x16d   : > { %v795_v21 = vmul.f32 %v793_v15, %v788_v18 }
 0x16e   : > { %v1661_v22 = vpop.f32.mrf.mxu1 }
 0x16f   : > { %v802_v23 = vadd.f32 %v800_v20, %v795_v21 }
 0x171   : > { %v803_v24 = vmax.f32 %v802_v23, 0.0 }
 0x173   : > { %v804_v25 = vpack.c.bf16 %v803_v24, %v803_v24 }
 0x175   : > { %1679 = vmatmul.mubr.msk.bf16.vlgmr.msra.gmra.mxu1 %vm844_vm4, %v804_v25 }
 0x176   : > { %1696 = vmatprep.mubr.msk.bf16.mxu1 %vm1791_vm0, %v1790_v0 }
 0x235   : > { %v886_v26 = vpop.f32.mrf.mxu1 }
 0x236   : > { %v892_v27 = vpack.c.bf16 %v886_v26, %v886_v26 }
 0x237   : > { %v1680_v28 = vpop.f32.mrf.mxu1 }
 0x238   : > { %993 = vrot.lane.b32.xlu0 %v892_v27, %s1794_s17  ;;  %897 = vrot.lane.b32.xlu1 %v892_v27, %s1792_s15  ;;  %v949_v41 = vsel %vm342_vm1, %v892_v27, 0 }
 0x239   : > { %v889_v29 = vpop.f32.mrf.mxu1 }
 0x23b   : > { %v1681_v30 = vpop.f32.mrf.mxu1 }
 0x23c   : > { %1095 = vrot.lane.b32.xlu0 %v892_v27, %s1795_s18  ;;  %1044 = vrot.lane.b32.xlu1 %v892_v27, %s1793_s16 }
 0x240   : > { %1197 = vrot.lane.b32.xlu0 %v892_v27, %s1796_s19  ;;  %1146 = vrot.lane.b32.xlu1 %v892_v27, %s1797_s20 }
 0x244   : > { %1299 = vrot.lane.b32.xlu0 %v892_v27, %s1798_s21  ;;  %1248 = vrot.lane.b32.xlu1 %v892_v27, %s1799_s22 }
 0x248   : > { %1358 = vperm.xlu0 %1769, %v1355_v31   ;;  %1351 = vperm.xlu1 %1770, %v1348_v32  }
 0x24c   : > { %1364 = vrot.lane.b32.xlu1 %v1362_v33, %s1795_s18 }
 0x2aa   : > { %v994_v34 = vpop.permute.xlu0 %993  ;;  %v898_v35 = vpop.permute.xlu1 %897 }
 0x2ab   : > { %v999_v36 = vsel %vm342_vm1, %v994_v34, 0  ;;  %v903_v37 = vsel %vm342_vm1, %v898_v35, 0 }
 0x2ac   : > { %1683 = vmatpush3.bf16.msra.mxu0 %v903_v37  ;;  %1695 = vmatpush3.bf16.msra.mxu1 %v999_v36 }
 0x2ad   : > { %1688 = vmatprep.subr.bf16.mxu0 %v1790_v0  ;;  %1706 = vmatprep.subr.bf16.mxu1 %v1790_v0 }
 0x2ae   : > { %v1096_v1 = vpop.permute.xlu0 %1095  ;;  %v1045_v42 = vpop.permute.xlu1 %1044 }
 0x2af   : > { %v1101_v40 = vsel %vm342_vm1, %v1096_v1, 0  ;;  %1685 = vmatmul.mubr.msk.bf16.vlgmr.msra.gmra.mxu0 %vm338_vm2, %v1541_v38  ;;  %1697 = vmatmul.mubr.msk.bf16.vlgmr.msra.gmra.mxu1 %vm338_vm2, %v1544_v39  ;;  %v1050_v46 = vsel %vm342_vm1, %v1045_v42, 0 }
 0x2b0   : > { %1689 = vmatpush3.bf16.msra.mxu0 %v949_v41  ;;  %1707 = vmatpush3.bf16.msra.mxu1 %v1101_v40 }
 0x2b1   : > { %1708 = vmatprep.mubr.msk.bf16.mxu1 %vm1791_vm0, %v1790_v0  ;;  %1718 = vmatprep.subr.bf16.mxu1 %v1790_v0 }
 0x2b2   : > { %1690 = vmatprep.mubr.msk.bf16.mxu0 %vm1791_vm0, %v1790_v0  ;;  %1700 = vmatprep.subr.bf16.mxu0 %v1790_v0  ;;  %v1198_v43 = vpop.permute.xlu0 %1197  ;;  %v1147_v48 = vpop.permute.xlu1 %1146 }
 0x2b3   : > { %v1203_v47 = vsel %vm342_vm1, %v1198_v43, 0  ;;  %v1152_v52 = vsel %vm342_vm1, %v1147_v48, 0 }
 0x2b6   : > { %v1300_v49 = vpop.permute.xlu0 %1299  ;;  %v1249_v54 = vpop.permute.xlu1 %1248 }
 0x2b7   : > { %1691 = vmatmul.mubr.msk.bf16.vlgmr.msra.gmra.mxu0 %vm338_vm2, %v893_v44  ;;  %1709 = vmatmul.mubr.msk.bf16.vlgmr.msra.gmra.mxu1 %vm338_vm2, %v1548_v45  ;;  %v1305_v53 = vsel %vm342_vm1, %v1300_v49, 0  ;;  %v1254_v57 = vsel %vm342_vm1, %v1249_v54, 0 }
 0x2b8   : > { %1701 = vmatpush3.bf16.msra.mxu0 %v1050_v46  ;;  %1719 = vmatpush3.bf16.msra.mxu1 %v1203_v47 }
 0x2b9   : > { %1702 = vmatprep.mubr.msk.bf16.mxu0 %vm1791_vm0, %v1790_v0  ;;  %1712 = vmatprep.subr.bf16.mxu0 %v1790_v0 }
 0x2ba   : > { %1720 = vmatprep.mubr.msk.bf16.mxu1 %vm1791_vm0, %v1790_v0  ;;  %1730 = vmatprep.subr.bf16.mxu1 %v1790_v0 }
 0x2bf   : > { %1703 = vmatmul.mubr.msk.bf16.vlgmr.msra.gmra.mxu0 %vm338_vm2, %v1546_v50  ;;  %1721 = vmatmul.mubr.msk.bf16.vlgmr.msra.gmra.mxu1 %vm338_vm2, %v1552_v51 }
 0x2c0   : > { %1713 = vmatpush3.bf16.msra.mxu0 %v1152_v52  ;;  %1731 = vmatpush3.bf16.msra.mxu1 %v1305_v53 }
 0x2c1   : > { %1714 = vmatprep.mubr.msk.bf16.mxu0 %vm1791_vm0, %v1790_v0  ;;  %1724 = vmatprep.subr.bf16.mxu0 %v1790_v0 }
 0x2c2   : > { %1732 = vmatprep.mubr.msk.bf16.mxu1 %vm1791_vm0, %v1790_v0 }
 0x2c3   : > { %v1352_v41 = vpop.permute.xlu1 %1351  ;;  %v1359_v45 = vpop.permute.xlu0 %1358 }
 0x2c7   : > { %1715 = vmatmul.mubr.msk.bf16.vlgmr.msra.gmra.mxu0 %vm338_vm2, %v1550_v55  ;;  %1733 = vmatmul.mubr.msk.bf16.vlgmr.msra.gmra.mxu1 %vm338_vm2, %v1556_v56  ;;  %v1365_v48 = vpop.permute.xlu1 %1364 }
 0x2c8   : > { %1725 = vmatpush3.bf16.msra.mxu0 %v1254_v57  ;;  %1726 = vmatprep.mubr.msk.bf16.mxu0 %vm1791_vm0, %v1790_v0 }
 0x2c9   : > { %1736 = vmatprep.subr.bf16.mxu0 %v1790_v0 }
 0x2cf   : > { %1727 = vmatmul.mubr.msk.bf16.vlgmr.msra.gmra.mxu0 %vm338_vm2, %v1554_v58 }
 0x2d0   : > { %1746 = vmatprep.mubr.msk.bf16.mxu0 %vm1791_vm0, %v1790_v0  ;;  %1737 = vmatpush3.bf16.msra.mxu0 %v1413_v60 }
 0x2d1   : > { %1738 = vmatprep.subr.bf16.mxu0 %v1790_v0 }
 0x2d4   : > { %1739 = vmatpush3.bf16.msra.mxu0 %v1778_v61 }
 0x2d5   : > { %1740 = vmatprep.subr.bf16.mxu0 %v1790_v0 }
 0x2d8   : > { %1741 = vmatpush3.bf16.msra.mxu0 %v1779_v62 }
 0x2d9   : > { %1742 = vmatprep.subr.bf16.mxu0 %v1790_v0 }
 0x2dc   : > { %1743 = vmatpush3.bf16.msra.mxu0 %v1780_v63 }
 0x2dd   : > { %1744 = vmatprep.subr.bf16.mxu0 %v1790_v0 }
 0x2e0   : > { %1745 = vmatpush3.bf16.msra.mxu0 %v1781_v2 }
 0x36f   : > { %v939_v3 = vpop.f32.mrf.mxu0  ;;  %v1035_v4 = vpop.f32.mrf.mxu1 }
 0x371   : > { %v1686_v5 = vpop.f32.mrf.mxu0  ;;  %v1698_v6 = vpop.f32.mrf.mxu1 }
 0x373   : > { %v942_v7 = vpop.f32.mrf.mxu0  ;;  %v1038_v8 = vpop.f32.mrf.mxu1 }
 0x375   : > { %v1687_v9 = vpop.f32.mrf.mxu0  ;;  %v1699_v10 = vpop.f32.mrf.mxu1 }
 0x377   : > { %v985_v11 = vpop.f32.mrf.mxu0  ;;  %v1137_v12 = vpop.f32.mrf.mxu1 }
 0x378   : > { %v986_v18 = vadd.f32 %v985_v11, %v939_v3 }
 0x379   : > { %v1692_v13 = vpop.f32.mrf.mxu0  ;;  %v1710_v14 = vpop.f32.mrf.mxu1 }
 0x37a   : > { %v1041_v23 = vadd.f32 %v1035_v4, %v986_v18 }
 0x37b   : > { %v988_v15 = vpop.f32.mrf.mxu0  ;;  %v1140_v16 = vpop.f32.mrf.mxu1 }
 0x37d   : > { %v1693_v0 = vpop.f32.mrf.mxu0  ;;  %v1711_v17 = vpop.f32.mrf.mxu1 }
 0x37f   : > { %v1086_v19 = vpop.f32.mrf.mxu0  ;;  %v1239_v20 = vpop.f32.mrf.mxu1 }
 0x380   : > { %v1092_v26 = vadd.f32 %v1086_v19, %v1041_v23 }
 0x381   : > { %v1704_v21 = vpop.f32.mrf.mxu0  ;;  %v1722_v22 = vpop.f32.mrf.mxu1 }
 0x382   : > { %v1143_v31 = vadd.f32 %v1137_v12, %v1092_v26 }
 0x383   : > { %v1089_v24 = vpop.f32.mrf.mxu0  ;;  %v1242_v25 = vpop.f32.mrf.mxu1 }
 0x385   : > { %v1705_v27 = vpop.f32.mrf.mxu0  ;;  %v1723_v28 = vpop.f32.mrf.mxu1 }
 0x387   : > { %v1188_v29 = vpop.f32.mrf.mxu0  ;;  %v1341_v30 = vpop.f32.mrf.mxu1 }
 0x388   : > { %v1194_v34 = vadd.f32 %v1188_v29, %v1143_v31 }
 0x389   : > { %v1716_v32 = vpop.f32.mrf.mxu0  ;;  %v1734_v33 = vpop.f32.mrf.mxu1 }
 0x38a   : > { %v1245_v39 = vadd.f32 %v1239_v20, %v1194_v34 }
 0x38b   : > { %v1191_v35 = vpop.f32.mrf.mxu0  ;;  %v1344_v36 = vpop.f32.mrf.mxu1 }
 0x38d   : > { %v1717_v37 = vpop.f32.mrf.mxu0  ;;  %v1735_v38 = vpop.f32.mrf.mxu1 }
 0x38f   : > { %v1290_v1 = vpop.f32.mrf.mxu0 }
 0x390   : > { %v1296_v40 = vadd.f32 %v1290_v1, %v1245_v39 }
 0x391   : > { %v1728_v42 = vpop.f32.mrf.mxu0 }
 0x392   : > { %v1347_v43 = vadd.f32 %v1341_v30, %v1296_v40 }
 0x393   : > { %v1293_v44 = vpop.f32.mrf.mxu0 }
 0x394   : > { %v1354_v46 = vmul.f32 %v1352_v41, %v1347_v43 }
 0x395   : > { %v1729_v47 = vpop.f32.mrf.mxu0 }
 0x396   : > { %v1361_v49 = vadd.f32 %v1359_v45, %v1354_v46 }
 0x398   : > { %v1367_v50 = vadd.f32 %v1365_v48, %v1361_v49 }
 0x39a   : > { %v1368_v51 = vmax.f32 %v1367_v50, 0.0 }
 0x39c   : > { %v1369_v52 = vpack.c.bf16 %v1368_v51, %v1368_v51 }
 0x39e   : > { %1747 = vmatmul.mubr.msk.bf16.vlgmr.msra.gmra.mxu0 %vm844_vm4, %v1369_v52 }
 0x45e   : > { %v1449_v53 = vpop.f32.mrf.mxu0 }
 0x45f   : > { %v1455_v54 = vpack.c.bf16 %v1449_v53, %v1449_v53 }
 0x460   : > { %v1748_v55 = vpop.f32.mrf.mxu0 }
 0x461   : > { %1456 = vst [vmem:[%s327_s23] sm:$0xf] %v1455_v54 }
 0x462   : > { %v1452_v56 = vpop.f32.mrf.mxu0 }
 0x464   : > { %v1749_v57 = vpop.f32.mrf.mxu0 }
 0x465 PF: > { %s19_s30 = sadd.s32 1, %s1788_s30  }
 0x466   : > { %p16_p4 = scmp.ge.s32.totalorder %s19_s30, 4  }
 0x468   :  { %18 = sbr.rel (!%p16_p4) target bundleno = 1 (0x1), region = 102 }

// kernel: _lambda_.2
= control target key start
LH: loop header
LB: loop body
LE: loop exit
PB: predicated region body
PF: predicated region fallthrough
CT: control target
= control target key end

     0   :  { %s2904_s21 = smov 0   ;;  %s3312_s0 = inlined_call_operand.vmem [shape: bf16[2,4,324], index: 0, kind: input, shape index: {}]   ;;  %s3313_s1 = inlined_call_operand.vmem [shape: bf16[9,8,4], index: 1, kind: input, shape index: {}]   ;;  %s3314_s2 = inlined_call_operand.vmem [shape: f32[8,1], index: 2, kind: input, shape index: {}, may-alias: {2,5,10}]   ;;  %s3315_s3 = inlined_call_operand.vmem [shape: f32[8,1], index: 3, kind: input, shape index: {}, may-alias: {3,6,11}]   ;;  %s3316_s4 = inlined_call_operand.vmem [shape: bf16[9,8,8], index: 4, kind: input, shape index: {}]   ;;  %s3317_s5 = inlined_call_operand.vmem [shape: f32[8,1], index: 5, kind: input, shape index: {}, may-alias: {2,5,10}]   ;;  %s3318_s6 = inlined_call_operand.vmem [shape: f32[8,1], index: 6, kind: input, shape index: {}, may-alias: {3,6,11}]   ;;  %s3319_s7 = inlined_call_operand.vmem [shape: bf16[267,128], index: 7, kind: input, shape index: {}]   ;;  %s3320_s8 = inlined_call_operand.vmem [shape: bf16[78,128], index: 8, kind: input, shape index: {}]   ;;  %s3321_s9 = inlined_call_operand.vmem [shape: bf16[8,4], index: 9, kind: input, shape index: {}]   ;;  %s3322_s10 = inlined_call_operand.vmem [shape: f32[8,1], index: 10, kind: input, shape index: {}, may-alias: {2,5,10}]   ;;  %s3323_s11 = inlined_call_operand.vmem [shape: f32[8,1], index: 11, kind: input, shape index: {}, may-alias: {3,6,11}]   ;;  %s3324_s12 = inlined_call_operand.vmem [shape: bf16[2,8,128], index: 12, kind: output, shape index: {}]  }
   0x1 LB: > { %s2440_s22 = sadd.s32 4294967295, %s2819_s21   ;;  %p2444_p0 = scmp.ge.s32.totalorder %s2819_s21, 1  ;;  %s2819_s21 = sphi %s2904_s21, %s22_s21  }
   0x2   : > { %p362_p1 = scmp.lt.s32.totalorder %s2819_s21, 3 }
   0x4   : > { %p363_p2 = pnand %p2444_p0, %p362_p1 }
   0x5   : > { %p403_p3 = scmp.lt.s32.totalorder (!%p363_p2), %s2440_s22, 1  ;;  %s2825_s27 = smov (!%p363_p2), 127  }
   0x6   : > { %366 = sbr.rel (%p363_p2) target bundleno = 1496 (0x5d8), region = 68  ;;  %s2826_s28 = smov (!%p363_p2), 126  }
   0x7   : > { %s2827_s29 = smov (!%p363_p2), 110   ;;  %s2828_s30 = smov (!%p363_p2), 109  }
   0x8   : > { %s2829_s13 = smov (!%p363_p2), 108   ;;  %s2830_s14 = smov (!%p363_p2), 92  }
   0x9   : > { %s2831_s15 = smov (!%p363_p2), 91   ;;  %s2832_s16 = smov (!%p363_p2), 90  }
   0xa   : > { %s2835_s24 = smov (!%p363_p2), 118   ;;  %s2836_s25 = smov (!%p363_p2), 116  }
   0xb   : > { %v422_v0 = vlaneseq  ;;  %v2821_v1 = vmov 1983009808   ;;  %v2822_v3 = vmov 0.0   ;;  %s3326_s22 = smov (!%p403_p3, %s2440_s22), 1  ;;  %vm2823_vm0 = vmmov 0   ;;  %v1380_v13 = vld [vmem:[%s3314_s2] sm:$0xff] }
   0xc   : > { %v420_v2 = vunpack.c.l.s4 %v2821_v1  ;;  %2621 = vmatprep.subr.bf16.mxu1 %v2822_v3  ;;  %2623 = vmatprep.mubr.msk.bf16.mxu1 %vm2823_vm0, %v2822_v3  ;;  %s2761_s23 = smul.u32 6, %s3326_s22  ;;  %v2824_v6 = vmov 0   ;;  %v1389_v14 = vld [vmem:[%s3315_s3] sm:$0xff]  ;;  %vm447_vm1 = vcmask 1041408   ;;  %vm440_vm2 = vcmask 1039360   ;;  %s2446_s18 = sshll.u32 %s3326_s22, 2 }
   0xd   : > { %v423_v4 = vshrl.u32 %v422_v0, 7  ;;  %489 = vmatprep.mubr.bf16.mxu0 %v2824_v6  ;;  %2788 = vset.pattern.permute.xlu0 %v2824_v6  ;;  %v2447_v19 = vld [vmem:[%s3313_s1 + $0x4] sm:$0xf]  ;;  %vm443_vm3 = vcmask 31744   ;;  %vm639_vm4 = vcmask 1031168   ;;  %vm746_vm5 = vcmask 900096  }
   0xe   : > { %v421_v5 = vunpack.c.0.s8 %v420_v2  ;;  %2789 = vset.pattern.permute.xlu1 %v2824_v6  ;;  %s407_s26 = scalar_lea.vmem %s3312_s0, %s2761_s23  ;;  %v414_v29 = vld [vmem:[%s3313_s1] sm:$0xf]  ;;  %v2454_v38 = vld [vmem:[%s3313_s1 + $0x8] sm:$0xf]  ;;  %vm853_vm6 = vcmask 891904   ;;  %vm960_vm7 = vcmask 883712  }
   0xf   : > { %v413_v8 = vld [vmem:[%s407_s26] sm:$0x3f]  ;;  %v2458_v47 = vld [vmem:[%s3313_s1 + $0xc] sm:$0xf]  ;;  %v2462_v55 = vld [vmem:[%s3313_s1 + $0x10] sm:$0xf] }
  0x10   : > { %v424_v7 = vsub.s32 %v421_v5, %v423_v4  ;;  %v418_v10 = vcombine.high %v413_v8, %v413_v8  ;;  %vm1067_vm8 = vcmask 752640   ;;  %v2466_v63 = vld [vmem:[%s3313_s1 + $0x14] sm:$0xf]  ;;  %vm1174_vm9 = vcmask 744448   ;;  %s2834_s23 = smov 117   ;;  %s2837_s26 = smov 106  }
  0x11   : > { %vm1281_vm10 = vcmask 736256   ;;  %vm1543_vm11 = vcmask 1044480   ;;  %vm1544_vm12 = vcmask 1045504   ;;  %vm1539_vm13 = vcmask 89088  }
  0x12   : > { %v425_v9 = vrot.slane %v413_v8, %v424_v7  ;;  %v432_v11 = vrot.slane %v418_v10, %v424_v7  ;;  %v2470_v8 = vld [vmem:[%s3313_s1 + $0x18] sm:$0xf]  ;;  %vm1641_vm14 = vcmask 1043456   ;;  %vm1637_vm15 = vcmask 64512  }
  0x14   : > { %434 = vrot.lane.b32.xlu0 %v425_v9, %s2825_s27  ;;  %v433_v12 = vcombine.high %v425_v9, %v425_v9  ;;  %438 = vrot.lane.b32.xlu1 %v432_v11, %s2825_s27  ;;  %v548_v22 = vsel %vm447_vm1, %v432_v11, 0  ;;  %v542_v25 = vsel %vm447_vm1, %v425_v9, 0 }
  0x18   : > { %436 = vrot.lane.b32.xlu0 %v433_v12, %s2825_s27  ;;  %633 = vrot.lane.b32.xlu1 %v425_v9, %s2826_s28 }
  0x1c   : > { %635 = vrot.lane.b32.xlu0 %v433_v12, %s2826_s28  ;;  %637 = vrot.lane.b32.xlu1 %v432_v11, %s2826_s28 }
  0x20   : > { %740 = vrot.lane.b32.xlu0 %v425_v9, %s2827_s29  ;;  %742 = vrot.lane.b32.xlu1 %v433_v12, %s2827_s29 }
  0x24   : > { %744 = vrot.lane.b32.xlu0 %v432_v11, %s2827_s29  ;;  %847 = vrot.lane.b32.xlu1 %v425_v9, %s2828_s30  ;;  %s2838_s29 = smov 107  }
  0x28   : > { %849 = vrot.lane.b32.xlu0 %v433_v12, %s2828_s30  ;;  %851 = vrot.lane.b32.xlu1 %v432_v11, %s2828_s30 }
  0x2c   : > { %954 = vrot.lane.b32.xlu0 %v425_v9, %s2829_s13  ;;  %956 = vrot.lane.b32.xlu1 %v433_v12, %s2829_s13 }
  0x30   : > { %958 = vrot.lane.b32.xlu0 %v432_v11, %s2829_s13  ;;  %1061 = vrot.lane.b32.xlu1 %v425_v9, %s2830_s14 }
  0x34   : > { %1063 = vrot.lane.b32.xlu0 %v433_v12, %s2830_s14  ;;  %1065 = vrot.lane.b32.xlu1 %v432_v11, %s2830_s14 }
  0x38   : > { %1168 = vrot.lane.b32.xlu0 %v425_v9, %s2831_s15  ;;  %1170 = vrot.lane.b32.xlu1 %v433_v12, %s2831_s15 }
  0x3c   : > { %1172 = vrot.lane.b32.xlu0 %v432_v11, %s2831_s15  ;;  %1275 = vrot.lane.b32.xlu1 %v425_v9, %s2832_s16 }
  0x40   : > { %1277 = vrot.lane.b32.xlu0 %v433_v12, %s2832_s16  ;;  %1279 = vrot.lane.b32.xlu1 %v432_v11, %s2832_s16 }
  0x44   : > { %1383 = vperm.xlu0 %2788, %v1380_v13   ;;  %1392 = vperm.xlu1 %2789, %v1389_v14  }
  0x86   : > { %v435_v15 = vpop.permute.xlu0 %434  ;;  %v439_v16 = vpop.permute.xlu1 %438 }
  0x87   : > { %v455_v17 = vsel %vm447_vm1, %v439_v16, 0 }
  0x88   : > { %2622 = vmatpush3.bf16.msra.mxu1 %v455_v17 }
  0x89   : > { %2627 = vmatprep.subr.bf16.mxu1 %v2822_v3 }
  0x8a   : > { %v437_v18 = vpop.permute.xlu0 %436  ;;  %v634_v24 = vpop.permute.xlu1 %633 }
  0x8b   : > { %v442_v20 = vsel %vm440_vm2, %v437_v18, %v439_v16  ;;  %v441_v21 = vsel %vm440_vm2, %v435_v15, %v437_v18  ;;  %2624 = vmatmul.mubr.msk.bf16.vlgmr.msra.gmra.mxu1 %vm443_vm3, %v2447_v19  ;;  %v2474_v15 = vld [vmem:[%s3313_s1 + $0x1c] sm:$0xf] }
  0x8c   : > { %2448 = vmatprep.subr.msk.bf16.mxu0 %vm447_vm1, %v442_v20  ;;  %v449_v23 = vsel %vm447_vm1, %v441_v21, 0  ;;  %2628 = vmatpush3.bf16.msra.mxu1 %v548_v22  ;;  %v3060_v20 = vld [vmem:[%s3319_s7 + $0x78] sm:$0xff]   ;;  %v3072_v22 = vld [vmem:[%s3319_s7 + $0x70] sm:$0xff]  }
  0x8d   : > { %472 = vmatpush1.bf16.msra.mxu0 %v449_v23  ;;  %2629 = vmatprep.mubr.msk.bf16.mxu1 %vm2823_vm0, %v2822_v3  ;;  %v3065_v21 = vld [vmem:[%s3319_s7 + $0x38] sm:$0xff]   ;;  %v3077_v23 = vld [vmem:[%s3319_s7 + $0x30] sm:$0xff]  }
  0x8e   : > { %2451 = vmatprep.subr.msk.bf16.mxu0 %vm447_vm1, %v433_v12  ;;  %v636_v26 = vpop.permute.xlu0 %635  ;;  %2633 = vmatprep.subr.bf16.mxu1 %v2822_v3  ;;  %v638_v27 = vpop.permute.xlu1 %637 }
  0x8f   : > { %v641_v28 = vsel %vm639_vm4, %v636_v26, %v638_v27  ;;  %v640_v31 = vsel %vm639_vm4, %v634_v24, %v636_v26  ;;  %v652_v32 = vsel %vm447_vm1, %v638_v27, 0  ;;  %v3084_v24 = vld [vmem:[%s3319_s7 + $0x68] sm:$0xff]   ;;  %v3096_v26 = vld [vmem:[%s3319_s7 + $0x60] sm:$0xff]  }
  0x90   : > { %2449 = vmatmul.mubr.msk.bf16.vlgmr.msra.gmra.mxu0 %vm443_vm3, %v2447_v19  ;;  %v646_v34 = vsel %vm447_vm1, %v640_v31, 0  ;;  %v2478_v19 = vld [vmem:[%s3313_s1 + $0x20] sm:$0xf]  ;;  %v3125_v31 = vld [vmem:[%s3319_s7 + $0x10] sm:$0xff]  }
  0x91   : > { %565 = vmatpush1.bf16.msra.mxu0 %v542_v25  ;;  %582 = vmatprep.mubr.bf16.mxu0 %v2824_v6  ;;  %v3089_v25 = vld [vmem:[%s3319_s7 + $0x28] sm:$0xff]   ;;  %v3101_v27 = vld [vmem:[%s3319_s7 + $0x20] sm:$0xff]  }
  0x92   : > { %2455 = vmatprep.subr.msk.bf16.mxu0 %vm447_vm1, %v641_v28  ;;  %v741_v30 = vpop.permute.xlu0 %740  ;;  %v743_v33 = vpop.permute.xlu1 %742  ;;  %v3108_v28 = vld [vmem:[%s3319_s7 + $0x58] sm:$0xff]  }
  0x93   : > { %2630 = vmatmul.mubr.msk.bf16.vlgmr.msra.gmra.mxu1 %vm443_vm3, %v414_v29  ;;  %v747_v41 = vsel %vm746_vm5, %v741_v30, %v743_v33  ;;  %v3120_v30 = vld [vmem:[%s3319_s7 + $0x50] sm:$0xff]  }
  0x94   : > { %2634 = vmatpush3.bf16.msra.mxu1 %v652_v32  ;;  %2635 = vmatprep.mubr.msk.bf16.mxu1 %vm2823_vm0, %v2822_v3  ;;  %v753_v43 = vsel %vm447_vm1, %v747_v41, 0  ;;  %v2803_v32 = vld [vmem:[%s3319_s7 + $0x80] sm:$0x3f]  }
  0x95   : > { %2639 = vmatprep.subr.bf16.mxu1 %v2822_v3 }
  0x96   : > { %v745_v35 = vpop.permute.xlu0 %744  ;;  %v848_v37 = vpop.permute.xlu1 %847 }
  0x97   : > { %v748_v36 = vsel %vm746_vm5, %v743_v33, %v745_v35  ;;  %v759_v40 = vsel %vm447_vm1, %v745_v35, 0  ;;  %v2833_v33 = vmov 65535  }
  0x98   : > { %2452 = vmatmul.mubr.msk.bf16.vlgmr.msra.gmra.mxu0 %vm443_vm3, %v414_v29  ;;  %v3113_v29 = vld [vmem:[%s3319_s7 + $0x18] sm:$0xff]  }
  0x99   : > { %669 = vmatpush1.bf16.msra.mxu0 %v646_v34  ;;  %686 = vmatprep.mubr.bf16.mxu0 %v2824_v6  ;;  %v1545_v34 = vsel %vm1543_vm11, 4294967295, %v2833_v33 }
  0x9a   : > { %2459 = vmatprep.subr.msk.bf16.mxu0 %vm447_vm1, %v748_v36  ;;  %v850_v39 = vpop.permute.xlu0 %849  ;;  %v852_v42 = vpop.permute.xlu1 %851  ;;  %v1546_v35 = vsel %vm1544_vm12, %v1545_v34, 0 }
  0x9b   : > { %2636 = vmatmul.mubr.msk.bf16.vlgmr.msra.gmra.mxu1 %vm443_vm3, %v2454_v38  ;;  %v2978_v45 = vsel %vm853_vm6, %v850_v39, %v852_v42  ;;  %v854_v48 = vsel %vm853_vm6, %v848_v37, %v850_v39  ;;  %v2989_v49 = vsel %vm447_vm1, %v852_v42, 0  ;;  %v3132_v36 = vand.u32 %v2803_v32, %v1546_v35  ;;  %v3137_v37 = vld [vmem:[%s3319_s7 + $0x48] sm:$0xff]   ;;  %v3151_v39 = vld [vmem:[%s3319_s7 + $0x40] sm:$0xff]  }
  0x9c   : > { %2640 = vmatpush3.bf16.msra.mxu1 %v759_v40  ;;  %2641 = vmatprep.mubr.msk.bf16.mxu1 %vm2823_vm0, %v2822_v3  ;;  %v2993_v51 = vsel %vm447_vm1, %v854_v48, 0  ;;  %v3156_v40 = vld [vmem:[%s3319_s7] sm:$0xff]  }
  0x9d   : > { %2645 = vmatprep.subr.bf16.mxu1 %v2822_v3 }
  0x9e   : > { %v955_v44 = vpop.permute.xlu0 %954  ;;  %v957_v46 = vpop.permute.xlu1 %956 }
  0x9f   : > { %v961_v57 = vsel %vm960_vm7, %v955_v44, %v957_v46 }
  0xa0   : > { %2456 = vmatmul.mubr.msk.bf16.vlgmr.msra.gmra.mxu0 %vm443_vm3, %v2454_v38  ;;  %v967_v59 = vsel %vm447_vm1, %v961_v57, 0  ;;  %v3143_v38 = vld [vmem:[%s3319_s7 + $0x8] sm:$0xff]  }
  0xa1   : > { %776 = vmatpush1.bf16.msra.mxu0 %v753_v43  ;;  %793 = vmatprep.mubr.bf16.mxu0 %v2824_v6 }
  0xa2   : > { %2463 = vmatprep.subr.msk.bf16.mxu0 %vm447_vm1, %v2978_v45  ;;  %v959_v50 = vpop.permute.xlu0 %958  ;;  %v1062_v52 = vpop.permute.xlu1 %1061 }
  0xa3   : > { %2642 = vmatmul.mubr.msk.bf16.vlgmr.msra.gmra.mxu1 %vm443_vm3, %v2458_v47  ;;  %v962_v53 = vsel %vm960_vm7, %v957_v46, %v959_v50  ;;  %v973_v56 = vsel %vm447_vm1, %v959_v50, 0 }
  0xa4   : > { %2646 = vmatpush3.bf16.msra.mxu1 %v2989_v49  ;;  %2647 = vmatprep.mubr.msk.bf16.mxu1 %vm2823_vm0, %v2822_v3 }
  0xa5   : > { %2651 = vmatprep.subr.bf16.mxu1 %v2822_v3 }
  0xa6   : > { %v1064_v54 = vpop.permute.xlu0 %1063  ;;  %v1066_v58 = vpop.permute.xlu1 %1065 }
  0xa7   : > { %v1069_v61 = vsel %vm1067_vm8, %v1064_v54, %v1066_v58  ;;  %v1068_v0 = vsel %vm1067_vm8, %v1062_v52, %v1064_v54  ;;  %v1080_v1 = vsel %vm447_vm1, %v1066_v58, 0 }
  0xa8   : > { %2460 = vmatmul.mubr.msk.bf16.vlgmr.msra.gmra.mxu0 %vm443_vm3, %v2458_v47  ;;  %v1074_v4 = vsel %vm447_vm1, %v1068_v0, 0 }
  0xa9   : > { %883 = vmatpush1.bf16.msra.mxu0 %v2993_v51  ;;  %900 = vmatprep.mubr.bf16.mxu0 %v2824_v6 }
  0xaa   : > { %2467 = vmatprep.subr.msk.bf16.mxu0 %vm447_vm1, %v962_v53  ;;  %v1169_v60 = vpop.permute.xlu0 %1168  ;;  %v1171_v62 = vpop.permute.xlu1 %1170 }
  0xab   : > { %2648 = vmatmul.mubr.msk.bf16.vlgmr.msra.gmra.mxu1 %vm443_vm3, %v2462_v55  ;;  %v1175_v10 = vsel %vm1174_vm9, %v1169_v60, %v1171_v62 }
  0xac   : > { %2652 = vmatpush3.bf16.msra.mxu1 %v973_v56  ;;  %2653 = vmatprep.mubr.msk.bf16.mxu1 %vm2823_vm0, %v2822_v3  ;;  %v1181_v13 = vsel %vm447_vm1, %v1175_v10, 0 }
  0xad   : > { %2657 = vmatprep.subr.bf16.mxu1 %v2822_v3 }
  0xae   : > { %v1173_v2 = vpop.permute.xlu0 %1172  ;;  %v1276_v5 = vpop.permute.xlu1 %1275 }
  0xaf   : > { %v1176_v7 = vsel %vm1174_vm9, %v1171_v62, %v1173_v2  ;;  %v1187_v9 = vsel %vm447_vm1, %v1173_v2, 0 }
  0xb0   : > { %2464 = vmatmul.mubr.msk.bf16.vlgmr.msra.gmra.mxu0 %vm443_vm3, %v2462_v55 }
  0xb1   : > { %990 = vmatpush1.bf16.msra.mxu0 %v967_v59  ;;  %1007 = vmatprep.mubr.bf16.mxu0 %v2824_v6 }
  0xb2   : > { %2471 = vmatprep.subr.msk.bf16.mxu0 %vm447_vm1, %v1069_v61  ;;  %v1278_v11 = vpop.permute.xlu0 %1277  ;;  %v1280_v12 = vpop.permute.xlu1 %1279 }
  0xb3   : > { %2654 = vmatmul.mubr.msk.bf16.vlgmr.msra.gmra.mxu1 %vm443_vm3, %v2466_v63  ;;  %v1283_v14 = vsel %vm1281_vm10, %v1278_v11, %v1280_v12  ;;  %v1282_v16 = vsel %vm1281_vm10, %v1276_v5, %v1278_v11  ;;  %v1294_v17 = vsel %vm447_vm1, %v1280_v12, 0 }
  0xb4   : > { %2658 = vmatpush3.bf16.msra.mxu1 %v1080_v1  ;;  %2659 = vmatprep.mubr.msk.bf16.mxu1 %vm2823_vm0, %v2822_v3  ;;  %v1288_v18 = vsel %vm447_vm1, %v1282_v16, 0 }
  0xb5   : > { %2663 = vmatprep.subr.bf16.mxu1 %v2822_v3 }
  0xb8   : > { %2468 = vmatmul.mubr.msk.bf16.vlgmr.msra.gmra.mxu0 %vm443_vm3, %v2466_v63 }
  0xb9   : > { %1097 = vmatpush1.bf16.msra.mxu0 %v1074_v4  ;;  %1114 = vmatprep.mubr.bf16.mxu0 %v2824_v6 }
  0xba   : > { %2475 = vmatprep.subr.msk.bf16.mxu0 %vm447_vm1, %v1176_v7 }
  0xbb   : > { %2660 = vmatmul.mubr.msk.bf16.vlgmr.msra.gmra.mxu1 %vm443_vm3, %v2470_v8 }
  0xbc   : > { %2664 = vmatpush3.bf16.msra.mxu1 %v1187_v9  ;;  %2665 = vmatprep.mubr.msk.bf16.mxu1 %vm2823_vm0, %v2822_v3 }
  0xbd   : > { %2669 = vmatprep.subr.bf16.mxu1 %v2822_v3 }
  0xc0   : > { %2472 = vmatmul.mubr.msk.bf16.vlgmr.msra.gmra.mxu0 %vm443_vm3, %v2470_v8 }
  0xc1   : > { %1204 = vmatpush1.bf16.msra.mxu0 %v1181_v13  ;;  %1221 = vmatprep.mubr.bf16.mxu0 %v2824_v6 }
  0xc2   : > { %2479 = vmatprep.subr.msk.bf16.mxu0 %vm447_vm1, %v1283_v14 }
  0xc3   : > { %2666 = vmatmul.mubr.msk.bf16.vlgmr.msra.gmra.mxu1 %vm443_vm3, %v2474_v15 }
  0xc4   : > { %2670 = vmatpush3.bf16.msra.mxu1 %v1294_v17  ;;  %2671 = vmatprep.mubr.msk.bf16.mxu1 %vm2823_vm0, %v2822_v3 }
  0xc5   : > { %2675 = vmatprep.subr.bf16.mxu1 %v2822_v3 }
  0xc8   : > { %2476 = vmatmul.mubr.msk.bf16.vlgmr.msra.gmra.mxu0 %vm443_vm3, %v2474_v15 }
  0xc9   : > { %1311 = vmatpush1.bf16.msra.mxu0 %v1288_v18  ;;  %1328 = vmatprep.mubr.bf16.mxu0 %v2824_v6 }
  0xca   : > { %2547 = vmatprep.subr.bf16.mxu0 %v3060_v20 }
  0xcb   : > { %2672 = vmatmul.mubr.msk.bf16.vlgmr.msra.gmra.mxu1 %vm443_vm3, %v2478_v19 }
  0xcc   : > { %2677 = vmatprep.mubr.msk.bf16.mxu1 %vm2823_vm0, %v2822_v3  ;;  %2676 = vmatpush3.bf16.msra.mxu1 %v3132_v36 }
  0xcd   : > { %2681 = vmatprep.subr.bf16.mxu1 %v2822_v3 }
  0xd0   : > { %2480 = vmatmul.mubr.msk.bf16.vlgmr.msra.gmra.mxu0 %vm443_vm3, %v2478_v19 }
  0xd1   : > { %2548 = vmatpush3.bf16.msra.mxu0 %v3065_v21 }
  0xd2   : > { %2549 = vmatprep.subr.bf16.mxu0 %v3072_v22 }
  0xd5   : > { %2550 = vmatpush3.bf16.msra.mxu0 %v3077_v23 }
  0xd6   : > { %2551 = vmatprep.subr.bf16.mxu0 %v3084_v24 }
  0xd9   : > { %2552 = vmatpush3.bf16.msra.mxu0 %v3089_v25 }
  0xda   : > { %2553 = vmatprep.subr.bf16.mxu0 %v3096_v26 }
  0xdd   : > { %2554 = vmatpush3.bf16.msra.mxu0 %v3101_v27 }
  0xde   : > { %2555 = vmatprep.subr.bf16.mxu0 %v3108_v28 }
  0xe1   : > { %2556 = vmatpush3.bf16.msra.mxu0 %v3113_v29 }
  0xe2   : > { %2557 = vmatprep.subr.bf16.mxu0 %v3120_v30 }
  0xe5   : > { %2558 = vmatpush3.bf16.msra.mxu0 %v3125_v31 }
  0xe6   : > { %2559 = vmatprep.subr.bf16.mxu0 %v3137_v37 }
  0xe9   : > { %2560 = vmatpush3.bf16.msra.mxu0 %v3143_v38 }
  0xea   : > { %2561 = vmatprep.subr.bf16.mxu0 %v3151_v39 }
  0xed   : > { %2562 = vmatpush3.bf16.msra.mxu0 %v3156_v40 }
  0xee   : > { %2699 = vmatprep.subr.bf16.mxu0 %v2822_v3 }
 0x14b   : > { %v532_v41 = vpop.f32.mrf.mxu1 }
 0x14d   : > { %v2625_v42 = vpop.f32.mrf.mxu1 }
 0x14f   : > { %v535_v44 = vpop.f32.mrf.mxu1 }
 0x150   : > { %v491_v43 = vpop.f32.mrf.mxu0 }
 0x151   : > { %v2626_v47 = vpop.f32.mrf.mxu1 }
 0x152   : > { %v493_v46 = vpop.f32.mrf.mxu0 }
 0x153   : > { %v625_v50 = vpop.f32.mrf.mxu1 }
 0x154   : > { %v495_v48 = vpop.f32.mrf.mxu0 }
 0x155   : > { %v2631_v53 = vpop.f32.mrf.mxu1 }
 0x156   : > { %v496_v52 = vpop.f32.mrf.mxu0 }
 0x157   : > { %v628_v55 = vpop.f32.mrf.mxu1 }
 0x158   : > { %v584_v54 = vpop.f32.mrf.mxu0 }
 0x159   : > { %v2632_v57 = vpop.f32.mrf.mxu1 }
 0x15a   : > { %v586_v56 = vpop.f32.mrf.mxu0 }
 0x15b   : > { %v729_v59 = vpop.f32.mrf.mxu1 }
 0x15c   : > { %v588_v58 = vpop.f32.mrf.mxu0 }
 0x15d   : > { %v2637_v61 = vpop.f32.mrf.mxu1  ;;  %v626_v58 = vadd.f32 %v625_v50, %v532_v41 }
 0x15e   : > { %v589_v60 = vpop.f32.mrf.mxu0 }
 0x15f   : > { %v732_v63 = vpop.f32.mrf.mxu1 }
 0x160   : > { %v688_v62 = vpop.f32.mrf.mxu0  ;;  %v737_v63 = vadd.f32 %v729_v59, %v626_v58 }
 0x161   : > { %v2638_v1 = vpop.f32.mrf.mxu1 }
 0x162   : > { %v690_v0 = vpop.f32.mrf.mxu0 }
 0x163   : > { %v836_v4 = vpop.f32.mrf.mxu1 }
 0x164   : > { %v692_v2 = vpop.f32.mrf.mxu0 }
 0x165   : > { %v2643_v7 = vpop.f32.mrf.mxu1  ;;  %v585_v2 = vadd.f32 %v584_v54, %v491_v43 }
 0x166   : > { %v693_v5 = vpop.f32.mrf.mxu0  ;;  %v844_v7 = vadd.f32 %v836_v4, %v737_v63 }
 0x167   : > { %v839_v9 = vpop.f32.mrf.mxu1 }
 0x168   : > { %v795_v8 = vpop.f32.mrf.mxu0 }
 0x169   : > { %v2644_v11 = vpop.f32.mrf.mxu1 }
 0x16a   : > { %v797_v10 = vpop.f32.mrf.mxu0  ;;  %v587_v11 = vadd.f32 %v586_v56, %v493_v46 }
 0x16b   : > { %v943_v13 = vpop.f32.mrf.mxu1 }
 0x16c   : > { %v799_v12 = vpop.f32.mrf.mxu0 }
 0x16d   : > { %v2649_v15 = vpop.f32.mrf.mxu1  ;;  %v735_v12 = vadd.f32 %v688_v62, %v585_v2 }
 0x16e   : > { %v800_v14 = vpop.f32.mrf.mxu0  ;;  %v951_v15 = vadd.f32 %v943_v13, %v844_v7  ;;  %v1384_v13 = vpop.permute.xlu0 %1383 }
 0x16f   : > { %v946_v17 = vpop.f32.mrf.mxu1 }
 0x170   : > { %v902_v16 = vpop.f32.mrf.mxu0 }
 0x171   : > { %v2650_v19 = vpop.f32.mrf.mxu1 }
 0x172   : > { %v904_v18 = vpop.f32.mrf.mxu0  ;;  %v736_v19 = vadd.f32 %v690_v0, %v587_v11 }
 0x173   : > { %v1050_v33 = vpop.f32.mrf.mxu1 }
 0x174   : > { %v906_v32 = vpop.f32.mrf.mxu0 }
 0x175   : > { %v2655_v35 = vpop.f32.mrf.mxu1  ;;  %v842_v32 = vadd.f32 %v795_v8, %v735_v12 }
 0x176   : > { %v907_v34 = vpop.f32.mrf.mxu0  ;;  %v1058_v35 = vadd.f32 %v1050_v33, %v951_v15  ;;  %v1393_v33 = vpop.permute.xlu1 %1392 }
 0x177   : > { %v1053_v44 = vpop.f32.mrf.mxu1  ;;  %v949_v41 = vadd.f32 %v902_v16, %v842_v32 }
 0x178   : > { %v1009_v42 = vpop.f32.mrf.mxu0 }
 0x179   : > { %v2656_v48 = vpop.f32.mrf.mxu1  ;;  %v1056_v43 = vadd.f32 %v1009_v42, %v949_v41 }
 0x17a   : > { %v1011_v47 = vpop.f32.mrf.mxu0  ;;  %v843_v48 = vadd.f32 %v797_v10, %v736_v19 }
 0x17b   : > { %v1157_v53 = vpop.f32.mrf.mxu1 }
 0x17c   : > { %v1013_v52 = vpop.f32.mrf.mxu0 }
 0x17d   : > { %v2661_v57 = vpop.f32.mrf.mxu1  ;;  %v1165_v52 = vadd.f32 %v1157_v53, %v1058_v35 }
 0x17e   : > { %v1014_v55 = vpop.f32.mrf.mxu0 }
 0x17f   : > { %v1160_v61 = vpop.f32.mrf.mxu1  ;;  %v950_v55 = vadd.f32 %v904_v18, %v843_v48 }
 0x180   : > { %v1116_v60 = vpop.f32.mrf.mxu0 }
 0x181   : > { %v2662_v5 = vpop.f32.mrf.mxu1  ;;  %v1057_v46 = vadd.f32 %v1011_v47, %v950_v55  ;;  %v1163_v56 = vadd.f32 %v1116_v60, %v1056_v43 }
 0x182   : > { %v1118_v1 = vpop.f32.mrf.mxu0 }
 0x183   : > { %v1264_v14 = vpop.f32.mrf.mxu1  ;;  %v1164_v8 = vadd.f32 %v1118_v1, %v1057_v46  ;;  %v2196_v46 = vld [vmem:[%s3323_s11] sm:$0xff] }
 0x184   : > { %v1120_v9 = vpop.f32.mrf.mxu0  ;;  %v1272_v4 = vadd.f32 %v1264_v14, %v1165_v52 }
 0x185   : > { %v2667_v34 = vpop.f32.mrf.mxu1 }
 0x186   : > { %v1121_v17 = vpop.f32.mrf.mxu0 }
 0x187   : > { %v1267_v50 = vpop.f32.mrf.mxu1 }
 0x188   : > { %v1223_v44 = vpop.f32.mrf.mxu0 }
 0x189   : > { %v2668_v54 = vpop.f32.mrf.mxu1  ;;  %v1270_v61 = vadd.f32 %v1223_v44, %v1163_v56  ;;  %v2187_v56 = vld [vmem:[%s3322_s10] sm:$0xff] }
 0x18a   : > { %v1225_v59 = vpop.f32.mrf.mxu0 }
 0x18b   : > { %v1371_v62 = vpop.f32.mrf.mxu1  ;;  %v1271_v2 = vadd.f32 %v1225_v59, %v1164_v8  ;;  %v2500_v8 = vld [vmem:[%s3316_s4 + $0x4] sm:$0xf] }
 0x18c   : > { %v1227_v57 = vpop.f32.mrf.mxu0  ;;  %v1379_v58 = vadd.f32 %v1371_v62, %v1272_v4  ;;  %v2095_v62 = vld [vmem:[%s3318_s6] sm:$0xff] }
 0x18d   : > { %v2673_v63 = vpop.f32.mrf.mxu1 }
 0x18e   : > { %v1228_v0 = vpop.f32.mrf.mxu0  ;;  %v1388_v10 = vmul.f32 %v1384_v13, %v1379_v58 }
 0x18f   : > { %v1374_v5 = vpop.f32.mrf.mxu1 }
 0x190   : > { %v1330_v16 = vpop.f32.mrf.mxu0  ;;  %v1397_v18 = vadd.f32 %v1393_v33, %v1388_v10  ;;  %v2505_v10 = vld [vmem:[%s3316_s4 + $0xc] sm:$0xf]  ;;  %v1631_v5 = vld [vmem:[%s3316_s4] sm:$0xf] }
 0x191   : > { %v1377_v53 = vadd.f32 %v1330_v16, %v1270_v61  ;;  %v2674_v11 = vpop.f32.mrf.mxu1 }
 0x192   : > { %v1332_v42 = vpop.f32.mrf.mxu0  ;;  %v1400_v47 = vmax.f32 %v1397_v18, 0.0 }
 0x193   : > { %v1386_v7 = vmul.f32 %v1384_v13, %v1377_v53  ;;  %v1378_v9 = vadd.f32 %v1332_v42, %v1271_v2 }
 0x194   : > { %v1334_v60 = vpop.f32.mrf.mxu0  ;;  %v1403_v15 = vpack.c.bf16 %v1400_v47, %v1400_v47  ;;  %v2503_v47 = vld [vmem:[%s3316_s4 + $0x8] sm:$0xf] }
 0x195   : > { %v1395_v12 = vadd.f32 %v1393_v33, %v1386_v7  ;;  %v1387_v14 = vmul.f32 %v1384_v13, %v1378_v9  ;;  %v2088_v13 = vld [vmem:[%s3317_s5] sm:$0xff]  ;;  %v2509_v7 = vld [vmem:[%s3316_s4 + $0x14] sm:$0xf] }
 0x196   : > { %v1335_v1 = vpop.f32.mrf.mxu0  ;;  %2678 = vmatmul.mubr.msk.bf16.vlgmr.msra.gmra.mxu1 %vm1539_vm13, %v1403_v15 }
 0x197   : > { %v1396_v17 = vadd.f32 %v1393_v33, %v1387_v14  ;;  %v1398_v19 = vmax.f32 %v1395_v12, 0.0  ;;  %2683 = vmatprep.mubr.msk.bf16.mxu1 %vm2823_vm0, %v2822_v3  ;;  %v2513_v12 = vld [vmem:[%s3316_s4 + $0x1c] sm:$0xf]  ;;  %v2102_v1 = vld [vmem:[%s3321_s9] sm:$0xf] }
 0x199   : > { %v1399_v32 = vmax.f32 %v1396_v17, 0.0  ;;  %v1401_v35 = vpack.c.bf16 %v1398_v19, %v1398_v19 }
 0x19b   : > { %v1402_v34 = vpack.c.bf16 %v1399_v32, %v1399_v32 }
 0x19d   : > { %1582 = vmatprep.mubr.bf16.mxu0 %v1402_v34 }
 0x19e   : > { %1583 = vmatmul.mubr.bf16.vlgmr.msra.gmra.mxu0 %v1401_v35 }
 0x19f   : > { %2701 = vmatprep.mubr.msk.bf16.mxu0 %vm2823_vm0, %v2822_v3 }
 0x256   : > { %v1624_v44 = vpop.f32.mrf.mxu1 }
 0x258   : > { %v2679_v48 = vpop.f32.mrf.mxu1 }
 0x25a   : > { %v1627_v41 = vpop.f32.mrf.mxu1 }
 0x25c   : > { %v2680_v52 = vpop.f32.mrf.mxu1 }
 0x25e   : > { %v2563_v50 = vpop.f32.mrf.mxu0 }
 0x260   : > { %v2564_v59 = vpop.f32.mrf.mxu0 }
 0x261   : > { %v2565_v55 = vadd.f32 %v2564_v59, %v2563_v50 }
 0x262   : > { %v2566_v43 = vpop.f32.mrf.mxu0 }
 0x263   : > { %v1625_v54 = vadd.f32 %v2565_v55, %v1624_v44 }
 0x264   : > { %v2567_v4 = vpop.f32.mrf.mxu0 }
 0x265   : > { %v1630_v57 = vpack.c.bf16 %v1625_v54, %v1625_v54 }
 0x267   : > { %1733 = vrot.lane.b32.xlu0 %v1630_v57, %s2826_s28  ;;  %1635 = vrot.lane.b32.xlu1 %v1630_v57, %s2825_s27  ;;  %v1689_v63 = vsel %vm1641_vm14, %v1630_v57, 0 }
 0x26b   : > { %1835 = vrot.lane.b32.xlu0 %v1630_v57, %s2834_s23  ;;  %1784 = vrot.lane.b32.xlu1 %v1630_v57, %s2835_s24  ;;  %s411_s24 = scalar_lea.vmem %s3324_s12, %s2446_s18 }
 0x26f   : > { %1937 = vrot.lane.b32.xlu0 %v1630_v57, %s2829_s13  ;;  %1886 = vrot.lane.b32.xlu1 %v1630_v57, %s2836_s25 }
 0x273   : > { %2039 = vrot.lane.b32.xlu0 %v1630_v57, %s2837_s26  ;;  %1988 = vrot.lane.b32.xlu1 %v1630_v57, %s2838_s29 }
 0x277   : > { %2199 = vperm.xlu0 %2788, %v2196_v46   ;;  %2190 = vperm.xlu1 %2789, %v2187_v56  }
 0x27b   : > { %2098 = vperm.xlu0 %2788, %v2095_v62   ;;  %2091 = vperm.xlu1 %2789, %v2088_v13  }
 0x2d9   : > { %v1636_v58 = vpop.permute.xlu1 %1635  ;;  %v1734_v53 = vpop.permute.xlu0 %1733 }
 0x2da   : > { %v1643_v0 = vsel %vm1641_vm14, %v1636_v58, 0  ;;  %v1739_v18 = vsel %vm1641_vm14, %v1734_v53, 0 }
 0x2db   : > { %2682 = vmatpush3.bf16.msra.mxu1 %v1643_v0 }
 0x2dc   : > { %2687 = vmatprep.subr.bf16.mxu1 %v2822_v3 }
 0x2dd   : > { %v1785_v61 = vpop.permute.xlu1 %1784  ;;  %v1836_v11 = vpop.permute.xlu0 %1835 }
 0x2de   : > { %v1790_v33 = vsel %vm1641_vm14, %v1785_v61, 0  ;;  %2684 = vmatmul.mubr.msk.bf16.vlgmr.msra.gmra.mxu1 %vm1637_vm15, %v2500_v8  ;;  %v1841_v60 = vsel %vm1641_vm14, %v1836_v11, 0 }
 0x2df   : > { %2688 = vmatpush3.bf16.msra.mxu1 %v1689_v63  ;;  %2700 = vmatpush3.bf16.msra.mxu0 %v1790_v33 }
 0x2e0   : > { %2711 = vmatprep.subr.bf16.mxu0 %v2822_v3  ;;  %2689 = vmatprep.mubr.msk.bf16.mxu1 %vm2823_vm0, %v2822_v3 }
 0x2e1   : > { %v1887_v16 = vpop.permute.xlu1 %1886  ;;  %2693 = vmatprep.subr.bf16.mxu1 %v2822_v3  ;;  %v1938_v14 = vpop.permute.xlu0 %1937 }
 0x2e2   : > { %v1892_v2 = vsel %vm1641_vm14, %v1887_v16, 0  ;;  %2702 = vmatmul.mubr.msk.bf16.vlgmr.msra.gmra.mxu0 %vm1637_vm15, %v2505_v10  ;;  %v1943_v15 = vsel %vm1641_vm14, %v1938_v14, 0 }
 0x2e3   : > { %2712 = vmatpush3.bf16.msra.mxu0 %v1892_v2  ;;  %2713 = vmatprep.mubr.msk.bf16.mxu0 %vm2823_vm0, %v2822_v3 }
 0x2e4   : > { %2723 = vmatprep.subr.bf16.mxu0 %v2822_v3 }
 0x2e5   : > { %v1989_v42 = vpop.permute.xlu1 %1988 }
 0x2e6   : > { %2690 = vmatmul.mubr.msk.bf16.vlgmr.msra.gmra.mxu1 %vm1637_vm15, %v1631_v5  ;;  %v1994_v9 = vsel %vm1641_vm14, %v1989_v42, 0 }
 0x2e7   : > { %2694 = vmatpush3.bf16.msra.mxu1 %v1739_v18  ;;  %2695 = vmatprep.mubr.msk.bf16.mxu1 %vm2823_vm0, %v2822_v3 }
 0x2e8   : > { %2705 = vmatprep.subr.bf16.mxu1 %v2822_v3 }
 0x2ea   : > { %2714 = vmatmul.mubr.msk.bf16.vlgmr.msra.gmra.mxu0 %vm1637_vm15, %v2509_v7 }
 0x2eb   : > { %2724 = vmatpush3.bf16.msra.mxu0 %v1994_v9  ;;  %2725 = vmatprep.mubr.msk.bf16.mxu0 %vm2823_vm0, %v2822_v3 }
 0x2ec   : > { %2517 = vmatprep.subr.msk.bf16.mxu0 %vm447_vm1, %v2978_v45  ;;  %v2507_v45 = vld [vmem:[%s3316_s4 + $0x10] sm:$0xf]  ;;  %vm2341_vm1 = vcmask 1046528  }
 0x2ee   : > { %2696 = vmatmul.mubr.msk.bf16.vlgmr.msra.gmra.mxu1 %vm1637_vm15, %v2503_v47 }
 0x2ef   : > { %2706 = vmatpush3.bf16.msra.mxu1 %v1841_v60  ;;  %2707 = vmatprep.mubr.msk.bf16.mxu1 %vm2823_vm0, %v2822_v3 }
 0x2f0   : > { %2717 = vmatprep.subr.bf16.mxu1 %v2822_v3 }
 0x2f2   : > { %2726 = vmatmul.mubr.msk.bf16.vlgmr.msra.gmra.mxu0 %vm1637_vm15, %v2513_v12  ;;  %v2191_v4 = vpop.permute.xlu1 %2190 }
 0x2f3   : > { %2121 = vmatpush1.bf16.msra.mxu0 %v2993_v51  ;;  %2138 = vmatprep.mubr.bf16.mxu0 %v2824_v6  ;;  %v2040_v51 = vpop.permute.xlu0 %2039  ;;  %v2511_v6 = vld [vmem:[%s3316_s4 + $0x18] sm:$0xf] }
 0x2f4   : > { %2591 = vmatprep.subr.bf16.mxu0 %v3060_v20  ;;  %v2045_v20 = vsel %vm1641_vm14, %v2040_v51, 0 }
 0x2f6   : > { %2708 = vmatmul.mubr.msk.bf16.vlgmr.msra.gmra.mxu1 %vm1637_vm15, %v2507_v45 }
 0x2f7   : > { %2718 = vmatpush3.bf16.msra.mxu1 %v1943_v15  ;;  %2719 = vmatprep.mubr.msk.bf16.mxu1 %vm2823_vm0, %v2822_v3  ;;  %v2200_v0 = vpop.permute.xlu0 %2199 }
 0x2f8   : > { %2729 = vmatprep.subr.bf16.mxu1 %v2822_v3 }
 0x2fa   : > { %2518 = vmatmul.mubr.msk.bf16.vlgmr.msra.gmra.mxu0 %vm443_vm3, %v2102_v1 }
 0x2fb   : > { %2592 = vmatpush3.bf16.msra.mxu0 %v3065_v21  ;;  %v2515_v21 = vld [vmem:[%s3316_s4 + $0x20] sm:$0xf] }
 0x2fc   : > { %2593 = vmatprep.subr.bf16.mxu0 %v3072_v22 }
 0x2fe   : > { %2720 = vmatmul.mubr.msk.bf16.vlgmr.msra.gmra.mxu1 %vm1637_vm15, %v2511_v6 }
 0x2ff   : > { %2730 = vmatpush3.bf16.msra.mxu1 %v2045_v20  ;;  %2731 = vmatprep.mubr.msk.bf16.mxu1 %vm2823_vm0, %v2822_v3 }
 0x300   : > { %2735 = vmatprep.subr.bf16.mxu1 %v2822_v3  ;;  %2594 = vmatpush3.bf16.msra.mxu0 %v3077_v23 }
 0x301   : > { %2595 = vmatprep.subr.bf16.mxu0 %v3084_v24 }
 0x304   : > { %2596 = vmatpush3.bf16.msra.mxu0 %v3089_v25 }
 0x305   : > { %2597 = vmatprep.subr.bf16.mxu0 %v3096_v26 }
 0x306   : > { %2732 = vmatmul.mubr.msk.bf16.vlgmr.msra.gmra.mxu1 %vm1637_vm15, %v2515_v21 }
 0x307   : > { %2736 = vmatpush3.bf16.msra.mxu1 %v2989_v49  ;;  %2737 = vmatprep.mubr.msk.bf16.mxu1 %vm2823_vm0, %v2822_v3 }
 0x308   : > { %2598 = vmatpush3.bf16.msra.mxu0 %v3101_v27  ;;  %2741 = vmatprep.subr.bf16.mxu1 %v2822_v3 }
 0x309   : > { %2599 = vmatprep.subr.bf16.mxu0 %v3108_v28 }
 0x30c   : > { %2600 = vmatpush3.bf16.msra.mxu0 %v3113_v29 }
 0x30d   : > { %2601 = vmatprep.subr.bf16.mxu0 %v3120_v30 }
 0x30e   : > { %2738 = vmatmul.mubr.msk.bf16.vlgmr.msra.gmra.mxu1 %vm443_vm3, %v2102_v1 }
 0x30f   : > { %2742 = vmatpush3.bf16.msra.mxu1 %v3132_v36  ;;  %2743 = vmatprep.mubr.msk.bf16.mxu1 %vm2823_vm0, %v2822_v3 }
 0x310   : > { %2602 = vmatpush3.bf16.msra.mxu0 %v3125_v31  ;;  %2747 = vmatprep.subr.bf16.mxu1 %v2822_v3 }
 0x311   : > { %2603 = vmatprep.subr.bf16.mxu0 %v3137_v37 }
 0x314   : > { %2604 = vmatpush3.bf16.msra.mxu0 %v3143_v38 }
 0x315   : > { %2605 = vmatprep.subr.bf16.mxu0 %v3151_v39 }
 0x318   : > { %2606 = vmatpush3.bf16.msra.mxu0 %v3156_v40 }
 0x39e   : > { %v1679_v49 = vpop.f32.mrf.mxu1 }
 0x3a0   : > { %v2685_v22 = vpop.f32.mrf.mxu1 }
 0x3a2   : > { %v1682_v23 = vpop.f32.mrf.mxu1  ;;  %v1826_v24 = vpop.f32.mrf.mxu0 }
 0x3a3   : > { %v2809_v23 = vld [vmem:[%s3320_s8 + $0x18] sm:$0xff]  }
 0x3a4   : > { %v2686_v25 = vpop.f32.mrf.mxu1  ;;  %v2703_v26 = vpop.f32.mrf.mxu0 }
 0x3a5   : > { %v2811_v25 = vld [vmem:[%s3320_s8 + $0x8] sm:$0xff]  }
 0x3a6   : > { %v1725_v27 = vpop.f32.mrf.mxu1  ;;  %v1829_v28 = vpop.f32.mrf.mxu0 }
 0x3a7   : > { %v1726_v29 = vadd.f32 %v1725_v27, %v1679_v49  ;;  %v2808_v49 = vld [vmem:[%s3320_s8 + $0x20] sm:$0x7f]  }
 0x3a8   : > { %v2691_v30 = vpop.f32.mrf.mxu1  ;;  %v2704_v31 = vpop.f32.mrf.mxu0  ;;  %v2343_v22 = vsel %vm2341_vm1, %v2808_v49, 0 }
 0x3a9   : > { %v2812_v30 = vld [vmem:[%s3320_s8] sm:$0xff]  }
 0x3aa   : > { %v1728_v36 = vpop.f32.mrf.mxu1  ;;  %v1928_v17 = vpop.f32.mrf.mxu0 }
 0x3ac   : > { %v2692_v37 = vpop.f32.mrf.mxu1  ;;  %v2715_v19 = vpop.f32.mrf.mxu0 }
 0x3ae   : > { %v1775_v38 = vpop.f32.mrf.mxu1  ;;  %v1931_v32 = vpop.f32.mrf.mxu0 }
 0x3af   : > { %v1781_v39 = vadd.f32 %v1775_v38, %v1726_v29  ;;  %v2092_v32 = vpop.permute.xlu1 %2091 }
 0x3b0   : > { %v2697_v34 = vpop.f32.mrf.mxu1  ;;  %v2716_v40 = vpop.f32.mrf.mxu0 }
 0x3b1   : > { %v1832_v35 = vadd.f32 %v1826_v24, %v1781_v39  ;;  %v2810_v24 = vld [vmem:[%s3320_s8 + $0x10] sm:$0xff]   ;;  %v2099_v39 = vpop.permute.xlu0 %2098 }
 0x3b2   : > { %v1778_v44 = vpop.f32.mrf.mxu1  ;;  %v2030_v48 = vpop.f32.mrf.mxu0 }
 0x3b4   : > { %v2698_v41 = vpop.f32.mrf.mxu1  ;;  %v2727_v50 = vpop.f32.mrf.mxu0 }
 0x3b6   : > { %v1877_v52 = vpop.f32.mrf.mxu1  ;;  %v2033_v59 = vpop.f32.mrf.mxu0 }
 0x3b7   : > { %v1883_v55 = vadd.f32 %v1877_v52, %v1832_v35 }
 0x3b8   : > { %v2709_v43 = vpop.f32.mrf.mxu1  ;;  %v2728_v54 = vpop.f32.mrf.mxu0 }
 0x3b9   : > { %v1934_v57 = vadd.f32 %v1928_v17, %v1883_v55 }
 0x3ba   : > { %v1880_v46 = vpop.f32.mrf.mxu1  ;;  %v2140_v56 = vpop.f32.mrf.mxu0 }
 0x3bb   : > { %v2193_v62 = vmul.f32 %v2191_v4, %v2140_v56 }
 0x3bc   : > { %v2710_v13 = vpop.f32.mrf.mxu1  ;;  %v2142_v58 = vpop.f32.mrf.mxu0 }
 0x3bd   : > { %v2194_v8 = vmul.f32 %v2191_v4, %v2142_v58  ;;  %v2202_v61 = vadd.f32 %v2200_v0, %v2193_v62 }
 0x3be   : > { %v1979_v33 = vpop.f32.mrf.mxu1  ;;  %v2144_v63 = vpop.f32.mrf.mxu0 }
 0x3bf   : > { %v2203_v10 = vadd.f32 %v2200_v0, %v2194_v8  ;;  %v1985_v16 = vadd.f32 %v1979_v33, %v1934_v57  ;;  %v2205_v42 = vpack.c.bf16 %v2202_v61, %v2202_v61 }
 0x3c0   : > { %v2721_v2 = vpop.f32.mrf.mxu1  ;;  %v2145_v53 = vpop.f32.mrf.mxu0 }
 0x3c1   : > { %v2206_v5 = vpack.c.bf16 %v2203_v10, %v2203_v10  ;;  %v2036_v18 = vadd.f32 %v2030_v48, %v1985_v16 }
 0x3c2   : > { %v1982_v7 = vpop.f32.mrf.mxu1 }
 0x3c3   : > { %2243 = vmatprep.mubr.bf16.mxu0 %v2206_v5 }
 0x3c4   : > { %v2722_v9 = vpop.f32.mrf.mxu1  ;;  %2244 = vmatmul.mubr.bf16.vlgmr.msra.gmra.mxu0 %v2205_v42 }
 0x3c6   : > { %v2081_v11 = vpop.f32.mrf.mxu1 }
 0x3c7   : > { %v2087_v47 = vadd.f32 %v2081_v11, %v2036_v18 }
 0x3c8   : > { %v2733_v60 = vpop.f32.mrf.mxu1 }
 0x3ca   : > { %v2084_v12 = vpop.f32.mrf.mxu1 }
 0x3cc   : > { %v2734_v14 = vpop.f32.mrf.mxu1 }
 0x3ce   : > { %v2181_v45 = vpop.f32.mrf.mxu1 }
 0x3cf   : > { %v2195_v15 = vmul.f32 %v2191_v4, %v2181_v45 }
 0x3d0   : > { %v2739_v1 = vpop.f32.mrf.mxu1 }
 0x3d1   : > { %v2204_v51 = vadd.f32 %v2200_v0, %v2195_v15 }
 0x3d2   : > { %v2184_v6 = vpop.f32.mrf.mxu1 }
 0x3d3   : > { %v2207_v20 = vpack.c.bf16 %v2204_v51, %v2204_v51 }
 0x3d4   : > { %v2740_v21 = vpop.f32.mrf.mxu1 }
 0x3d5   : > { %2744 = vmatmul.mubr.msk.bf16.vlgmr.msra.gmra.mxu1 %vm1539_vm13, %v2207_v20 }
 0x3d6   : > { %2757 = vmatprep.mubr.msk.bf16.mxu1 %vm2823_vm0, %v2822_v3  ;;  %2748 = vmatpush3.bf16.msra.mxu1 %v2343_v22  ;;  %vm2337_vm0 = vcmask 637952  }
 0x3d7   : > { %2749 = vmatprep.subr.bf16.mxu1 %v2822_v3 }
 0x3da   : > { %2750 = vmatpush3.bf16.msra.mxu1 %v2809_v23 }
 0x3db   : > { %2751 = vmatprep.subr.bf16.mxu1 %v2822_v3 }
 0x3de   : > { %2752 = vmatpush3.bf16.msra.mxu1 %v2810_v24 }
 0x3df   : > { %2753 = vmatprep.subr.bf16.mxu1 %v2822_v3 }
 0x3e2   : > { %2754 = vmatpush3.bf16.msra.mxu1 %v2811_v25 }
 0x3e3   : > { %2755 = vmatprep.subr.bf16.mxu1 %v2822_v3  ;;  %v2094_v3 = vmul.f32 %v2092_v32, %v2087_v47 }
 0x3e5   : > { %v2101_v34 = vadd.f32 %v2099_v39, %v2094_v3 }
 0x3e6   : > { %2756 = vmatpush3.bf16.msra.mxu1 %v2812_v30 }
 0x484   : > { %v2607_v26 = vpop.f32.mrf.mxu0 }
 0x486   : > { %v2608_v27 = vpop.f32.mrf.mxu0 }
 0x487   : > { %v2609_v31 = vadd.f32 %v2608_v27, %v2607_v26 }
 0x488   : > { %v2610_v28 = vpop.f32.mrf.mxu0 }
 0x48a   : > { %v2611_v29 = vpop.f32.mrf.mxu0 }
 0x495   : > { %v2285_v36 = vpop.f32.mrf.mxu1 }
 0x496   : > { %v2286_v17 = vadd.f32 %v2609_v31, %v2285_v36 }
 0x497   : > { %v2745_v37 = vpop.f32.mrf.mxu1 }
 0x498   : > { %2292 = vrot.lane.b32.xlu1 %v2286_v17, %s2834_s23 }
 0x499   : > { %v2288_v19 = vpop.f32.mrf.mxu1 }
 0x49b   : > { %v2746_v38 = vpop.f32.mrf.mxu1 }
 0x50a   : > { %v2293_v40 = vpop.permute.xlu1 %2292 }
 0x50b   : > { %v2295_v35 = vadd.f32 %v2293_v40, %v2101_v34 }
 0x50d   : > { %v2296_v44 = vmax.f32 %v2295_v35, 0.0 }
 0x50f   : > { %v2297_v48 = vpack.c.bf16 %v2296_v44, %v2296_v44 }
 0x511   : > { %2758 = vmatmul.mubr.msk.bf16.vlgmr.msra.gmra.mxu1 %vm2337_vm0, %v2297_v48 }
 0x5d1   : > { %v2379_v41 = vpop.f32.mrf.mxu1 }
 0x5d2   : > { %v2385_v50 = vpack.c.bf16 %v2379_v41, %v2379_v41 }
 0x5d3   : > { %v2759_v52 = vpop.f32.mrf.mxu1 }
 0x5d4   : > { %2386 = vst [vmem:[%s411_s24] sm:$0xf] %v2385_v50 }
 0x5d5   : > { %v2382_v59 = vpop.f32.mrf.mxu1 }
 0x5d7   : > { %v2760_v55 = vpop.f32.mrf.mxu1 }
 0x5d8 PF: > { %s22_s21 = sadd.s32 1, %s2819_s21  }
 0x5d9   : > { %p19_p4 = scmp.ge.s32.totalorder %s22_s21, 4  }
 0x5db   :  { %21 = sbr.rel (!%p19_p4) target bundleno = 1 (0x1), region = 114 }

</bundles_post_ra>
